<compile_context>
chip_gen: v6e
topology: v6e:2x2x1
jax: 0.10.0
libtpu: 0.0.40
codegen_flags: <defaults>
</compile_context>

<pallas_src>
import functools
import math

import jax
import jax.numpy as jnp
from jax.experimental import pallas as pl
from jax.experimental.pallas import tpu as pltpu


# Whole-array-in-VMEM spec (no grid, no pipelining for these tiny shapes).
_VMEM_SPEC = pl.BlockSpec(memory_space=pltpu.MemorySpace.VMEM)


# ----------------------------------------------------------------------------
# Kernel 1: encoder
#   x_MLP([Cx; Tx]) -> x0 (context rows) / t0 (target rows)
#   SetTransformer stand-in (r head, z head) on the context set -> rc, zc
# ----------------------------------------------------------------------------

def _feld_encoder_kernel(
        xin_ref, cy_ref, pool_ref,
        xw1_ref, xb1_ref, xw2_ref, xb2_ref,
        rw1x_ref, rw1y_ref, rb1_ref, rw2_ref, rb2_ref,
        zw1x_ref, zw1y_ref, zb1_ref, zw2_ref, zb2_ref,
        rc_ref, zc_ref, t0_ref, *, n_ctx_rows):
    # Shared 2-layer x_MLP over stacked context+target x rows (one pass).
    h = jnp.dot(xin_ref[...], xw1_ref[...], preferred_element_type=jnp.float32)
    h = jnp.maximum(h + xb1_ref[...], 0.0)
    x0 = jnp.dot(h, xw2_ref[...], preferred_element_type=jnp.float32) + xb2_ref[...]
    x0c = x0[:n_ctx_rows, :]            # context rows (B*Nc, hid)
    t0_ref[...] = x0[n_ctx_rows:, :]    # target rows  (B*Nt, hid)

    cy = cy_ref[...]
    pool = pool_ref[...]                # (B, B*Nc) per-batch mean-pool matrix

    # r head: concat([x0, Cy]) @ W1 == x0 @ W1[:hid] + Cy @ W1[hid:]
    hr = jnp.dot(x0c, rw1x_ref[...], preferred_element_type=jnp.float32)
    hr = hr + jnp.dot(cy, rw1y_ref[...], preferred_element_type=jnp.float32)
    hr = jnp.maximum(hr + rb1_ref[...], 0.0)
    pr = jnp.dot(pool, hr, preferred_element_type=jnp.float32)      # (B, st_hid)
    rc_ref[...] = (jnp.dot(pr, rw2_ref[...], preferred_element_type=jnp.float32)
                   + rb2_ref[...])

    # z head (eval path only needs the mu half of z_ST's output; the weights
    # were pre-sliced in the wrapper, so sigma_z / KL work is skipped).
    hz = jnp.dot(x0c, zw1x_ref[...], preferred_element_type=jnp.float32)
    hz = hz + jnp.dot(cy, zw1y_ref[...], preferred_element_type=jnp.float32)
    hz = jnp.maximum(hz + zb1_ref[...], 0.0)
    pz = jnp.dot(pool, hz, preferred_element_type=jnp.float32)
    zc_ref[...] = (jnp.dot(pz, zw2_ref[...], preferred_element_type=jnp.float32)
                   + zb2_ref[...])


# ----------------------------------------------------------------------------
# Kernel 2: decoder
#   W = layernorm(r + W_MLP(z)); param = t0 . W^T (contract over hid);
#   Normal head -> pred (= mu at eval), in-kernel sums for NLL / MSE.
# ----------------------------------------------------------------------------

def _feld_decoder_kernel(
        r_ref, z_ref,
        ww1_ref, wb1_ref, ww2_ref, wb2_ref, g_ref, b_ref,
        t0_ref, ty_ref,
        pred_ref, lsum_ref, ssum_ref, *, y_dim):
    B = r_ref.shape[0]
    half_log2pi = 0.5 * math.log(2.0 * math.pi)
    logp_tot = jnp.zeros((1, 1), jnp.float32)
    sq_tot = jnp.zeros((1, 1), jnp.float32)

    # Static unroll over the (tiny) batch: leading-dim ref indexing only, so
    # no non-aligned sublane slicing / relayout is required inside the kernel.
    for b in range(B):
        # W_MLP(z) + residual + LayerNorm over hid (eps matches nn.LayerNorm)
        z_b = z_ref[b]                                  # (2*y_dim, hid)
        h = jnp.dot(z_b, ww1_ref[...], preferred_element_type=jnp.float32)
        h = jnp.maximum(h + wb1_ref[...], 0.0)
        wz = (jnp.dot(h, ww2_ref[...], preferred_element_type=jnp.float32)
              + wb2_ref[...])
        x = r_ref[b] + wz
        mean = jnp.mean(x, axis=-1, keepdims=True)
        var = jnp.mean(jnp.square(x - mean), axis=-1, keepdims=True)
        w_b = (x - mean) * jax.lax.rsqrt(var + 1e-5) * g_ref[...] + b_ref[...]

        # param[n, j] = sum_h t0[n, h] * W[j, h]  (no transposed W materialized)
        param = jax.lax.dot_general(
            t0_ref[b], w_b, (((1,), (1,)), ((), ())),
            preferred_element_type=jnp.float32)         # (Nt, 2*y_dim)

        mu = param[:, :y_dim]
        omega = param[:, y_dim:]
        sigma = 0.1 + 0.9 * jax.nn.softplus(omega)
        diff = ty_ref[b] - mu
        logp = -0.5 * jnp.square(diff / sigma) - jnp.log(sigma) - half_log2pi

        pred_ref[b] = mu                                # eval mode -> dist.mean
        logp_tot = logp_tot + jnp.sum(logp, keepdims=True)
        sq_tot = sq_tot + jnp.sum(jnp.square(diff), keepdims=True)

    lsum_ref[...] = logp_tot
    ssum_ref[...] = sq_tot


# ----------------------------------------------------------------------------
# Parameter init (deterministic, PyTorch-Linear-style uniform init)
# ----------------------------------------------------------------------------

def _linear_params(key, din, dout):
    k1, k2 = jax.random.split(key)
    bound = 1.0 / math.sqrt(din)
    w = jax.random.uniform(k1, (din, dout), jnp.float32, -bound, bound)
    b = jax.random.uniform(k2, (1, dout), jnp.float32, -bound, bound)
    return w, b


def init_feld_params(key, x_dim, hid_dim, y_dim, st_hid=64):
    fea_dim = hid_dim * y_dim * 2
    keys = jax.random.split(key, 8)
    p = {}
    p["x_w1"], p["x_b1"] = _linear_params(keys[0], x_dim, hid_dim)
    p["x_w2"], p["x_b2"] = _linear_params(keys[1], hid_dim, hid_dim)
    # TODO(synk): SetTransformer is undefined in the reference source; using a
    #             linear -> ReLU -> mean-pool-over-set -> linear pooling net.
    p["r_w1"], p["r_b1"] = _linear_params(keys[2], hid_dim + y_dim, st_hid)
    p["r_w2"], p["r_b2"] = _linear_params(keys[3], st_hid, fea_dim)
    p["z_w1"], p["z_b1"] = _linear_params(keys[4], hid_dim + y_dim, st_hid)
    p["z_w2"], p["z_b2"] = _linear_params(keys[5], st_hid, 2 * fea_dim)
    p["w_w1"], p["w_b1"] = _linear_params(keys[6], hid_dim, hid_dim)
    p["w_w2"], p["w_b2"] = _linear_params(keys[7], hid_dim, hid_dim)
    p["ln_g"] = jnp.ones((1, hid_dim), jnp.float32)
    p["ln_b"] = jnp.zeros((1, hid_dim), jnp.float32)
    return p


# ----------------------------------------------------------------------------
# FELD forward (eval path)
# ----------------------------------------------------------------------------

def feld_forward(params, C, T, x_dim, y_dim, hid_dim):
    B, Nc, _ = C.shape
    Nt = T.shape[1]
    fea = hid_dim * y_dim * 2
    n2y = 2 * y_dim

    Cx, Cy = C[..., :x_dim], C[..., -y_dim:]
    Tx, Ty = T[..., :x_dim], T[..., -y_dim:]

    # Stack context+target x rows so the shared x_MLP runs once.
    xin = jnp.concatenate(
        [Cx.reshape(B * Nc, x_dim), Tx.reshape(B * Nt, x_dim)], axis=0)
    cy2d = Cy.reshape(B * Nc, y_dim)
    # Per-batch mean-pool over the set as a matmul (keeps encoder 2-D / MXU).
    pool_mat = jnp.kron(jnp.eye(B, dtype=jnp.float32),
                        jnp.full((1, Nc), 1.0 / Nc, jnp.float32))   # (B, B*Nc)

    rw1, zw1 = params["r_w1"], params["z_w1"]
    rc, zc, t0 = pl.pallas_call(
        functools.partial(_feld_encoder_kernel, n_ctx_rows=B * Nc),
        out_shape=(jax.ShapeDtypeStruct((B, fea), jnp.float32),
                   jax.ShapeDtypeStruct((B, fea), jnp.float32),
                   jax.ShapeDtypeStruct((B * Nt, hid_dim), jnp.float32)),
        in_specs=[_VMEM_SPEC] * 17,
        out_specs=(_VMEM_SPEC, _VMEM_SPEC, _VMEM_SPEC),
    )(xin, cy2d, pool_mat,
      params["x_w1"], params["x_b1"], params["x_w2"], params["x_b2"],
      rw1[:hid_dim], rw1[hid_dim:], params["r_b1"],
      params["r_w2"], params["r_b2"],
      zw1[:hid_dim], zw1[hid_dim:], params["z_b1"],
      params["z_w2"][:, :fea], params["z_b2"][:, :fea])

    # lane -> sublane reshape of the latents done here (tiny, plain XLA)
    # instead of inside the kernel; matches PyTorch's rc.reshape(-1, 2y, hid).
    r3 = rc.reshape(B, n2y, hid_dim)
    z3 = zc.reshape(B, n2y, hid_dim)
    t03 = t0.reshape(B, Nt, hid_dim)

    pred, logp_sum, sqerr_sum = pl.pallas_call(
        functools.partial(_feld_decoder_kernel, y_dim=y_dim),
        out_shape=(jax.ShapeDtypeStruct((B, Nt, y_dim), jnp.float32),
                   jax.ShapeDtypeStruct((1, 1), jnp.float32),
                   jax.ShapeDtypeStruct((1, 1), jnp.float32)),
        in_specs=[_VMEM_SPEC] * 10,
        out_specs=(_VMEM_SPEC, _VMEM_SPEC, _VMEM_SPEC),
    )(r3, z3,
      params["w_w1"], params["w_b1"], params["w_w2"], params["w_b2"],
      params["ln_g"], params["ln_b"], t03, Ty)

    # Reference: NLL = -log_prob.sum(-1).mean() ; MSE = mean over all elems.
    NLL = -logp_sum[0, 0] / (B * Nt)
    KL = 0.0                       # eval path: z = dist.mean, KL unused
    feld_loss = KL + NLL
    T_MSE = sqerr_sum[0, 0] / (B * Nt * y_dim)
    return feld_loss, T_MSE, pred


# ----------------------------------------------------------------------------
# Demo
# ----------------------------------------------------------------------------

if __name__ == "__main__":
    x_dim, y_dim, hid_dim = 3, 2, 32
    B, Nc, Nt = 2, 16, 8

    key = jax.random.PRNGKey(0)
    kp, kc, kt = jax.random.split(key, 3)
    params = init_feld_params(kp, x_dim, hid_dim, y_dim)
    C = jax.random.normal(kc, (B, Nc, x_dim + y_dim), jnp.float32)
    T = jax.random.normal(kt, (B, Nt, x_dim + y_dim), jnp.float32)

    fwd = jax.jit(functools.partial(feld_forward, x_dim=x_dim, y_dim=y_dim,
                                    hid_dim=hid_dim))
    loss, t_mse, pred = fwd(params, C, T)
    jax.block_until_ready((loss, t_mse, pred))
    assert pred.shape == (B, Nt, y_dim)
    assert bool(jnp.isfinite(loss)) and bool(jnp.isfinite(t_mse))
    assert bool(jnp.all(jnp.isfinite(pred)))
    print("KERNEL_OK")
</pallas_src>

<mosaic_0001>
module attributes {stable_mosaic.version = 11 : i64} {
  func.func @_feld_encoder_kernel(%arg0: memref<48x3xf32, #tpu.memory_space<vmem>>, %arg1: memref<32x2xf32, #tpu.memory_space<vmem>>, %arg2: memref<2x32xf32, #tpu.memory_space<vmem>>, %arg3: memref<3x32xf32, #tpu.memory_space<vmem>>, %arg4: memref<1x32xf32, #tpu.memory_space<vmem>>, %arg5: memref<32x32xf32, #tpu.memory_space<vmem>>, %arg6: memref<1x32xf32, #tpu.memory_space<vmem>>, %arg7: memref<32x64xf32, #tpu.memory_space<vmem>>, %arg8: memref<2x64xf32, #tpu.memory_space<vmem>>, %arg9: memref<1x64xf32, #tpu.memory_space<vmem>>, %arg10: memref<64x128xf32, #tpu.memory_space<vmem>>, %arg11: memref<1x128xf32, #tpu.memory_space<vmem>>, %arg12: memref<32x64xf32, #tpu.memory_space<vmem>>, %arg13: memref<2x64xf32, #tpu.memory_space<vmem>>, %arg14: memref<1x64xf32, #tpu.memory_space<vmem>>, %arg15: memref<64x128xf32, #tpu.memory_space<vmem>>, %arg16: memref<1x128xf32, #tpu.memory_space<vmem>>, %arg17: memref<2x128xf32, #tpu.memory_space<vmem>>, %arg18: memref<2x128xf32, #tpu.memory_space<vmem>>, %arg19: memref<16x32xf32, #tpu.memory_space<vmem>>) attributes {dimension_semantics = [], scalar_prefetch = 0 : i64, scratch_operands = 0 : i64, tpu.core_type = #tpu.core_type<tc>} {
    %c0 = arith.constant 0 : index
    %c0_0 = arith.constant 0 : index
    %0 = vector.load %arg0[%c0, %c0_0] : memref<48x3xf32, #tpu.memory_space<vmem>>, vector<48x3xf32>
    %c0_1 = arith.constant 0 : index
    %c0_2 = arith.constant 0 : index
    %1 = vector.load %arg3[%c0_1, %c0_2] : memref<3x32xf32, #tpu.memory_space<vmem>>, vector<3x32xf32>
    %cst = arith.constant dense<0.000000e+00> : vector<48x32xf32>
    %2 = tpu.matmul %0, %1, %cst {dimension_numbers = #tpu.dot_dimension_numbers<[1], [0], [0], [1], [0, 0, 1, 1], [], []>} : vector<48x3xf32>, vector<3x32xf32>, vector<48x32xf32> -> vector<48x32xf32>
    %c0_3 = arith.constant 0 : index
    %c0_4 = arith.constant 0 : index
    %3 = vector.load %arg4[%c0_3, %c0_4] : memref<1x32xf32, #tpu.memory_space<vmem>>, vector<1x32xf32>
    %4 = vector.broadcast %3 : vector<1x32xf32> to vector<48x32xf32>
    %5 = arith.addf %2, %4 : vector<48x32xf32>
    %cst_5 = arith.constant 0.000000e+00 : f32
    %6 = vector.broadcast %cst_5 : f32 to vector<48x32xf32>
    %7 = arith.maximumf %5, %6 : vector<48x32xf32>
    %c0_6 = arith.constant 0 : index
    %c0_7 = arith.constant 0 : index
    %8 = vector.load %arg5[%c0_6, %c0_7] : memref<32x32xf32, #tpu.memory_space<vmem>>, vector<32x32xf32>
    %cst_8 = arith.constant dense<0.000000e+00> : vector<48x32xf32>
    %9 = tpu.matmul %7, %8, %cst_8 {dimension_numbers = #tpu.dot_dimension_numbers<[1], [0], [0], [1], [0, 0, 1, 1], [], []>} : vector<48x32xf32>, vector<32x32xf32>, vector<48x32xf32> -> vector<48x32xf32>
    %c0_9 = arith.constant 0 : index
    %c0_10 = arith.constant 0 : index
    %10 = vector.load %arg6[%c0_9, %c0_10] : memref<1x32xf32, #tpu.memory_space<vmem>>, vector<1x32xf32>
    %11 = vector.broadcast %10 : vector<1x32xf32> to vector<48x32xf32>
    %12 = arith.addf %9, %11 : vector<48x32xf32>
    %13 = vector.extract_strided_slice %12 {offsets = [0, 0], sizes = [32, 32], strides = [1, 1]} : vector<48x32xf32> to vector<32x32xf32>
    %14 = vector.extract_strided_slice %12 {offsets = [32, 0], sizes = [16, 32], strides = [1, 1]} : vector<48x32xf32> to vector<16x32xf32>
    %c0_11 = arith.constant 0 : index
    %c0_12 = arith.constant 0 : index
    %15 = vector.load %arg19[%c0_11, %c0_12] : memref<16x32xf32, #tpu.memory_space<vmem>>, vector<16x32xf32>
    tpu.vector_store %arg19[%c0_11, %c0_12], %14 {strides = array<i32>} : memref<16x32xf32, #tpu.memory_space<vmem>>, vector<16x32xf32>,
    %c0_13 = arith.constant 0 : index
    %c0_14 = arith.constant 0 : index
    %16 = vector.load %arg1[%c0_13, %c0_14] : memref<32x2xf32, #tpu.memory_space<vmem>>, vector<32x2xf32>
    %c0_15 = arith.constant 0 : index
    %c0_16 = arith.constant 0 : index
    %17 = vector.load %arg2[%c0_15, %c0_16] : memref<2x32xf32, #tpu.memory_space<vmem>>, vector<2x32xf32>
    %c0_17 = arith.constant 0 : index
    %c0_18 = arith.constant 0 : index
    %18 = vector.load %arg7[%c0_17, %c0_18] : memref<32x64xf32, #tpu.memory_space<vmem>>, vector<32x64xf32>
    %cst_19 = arith.constant dense<0.000000e+00> : vector<32x64xf32>
    %19 = tpu.matmul %13, %18, %cst_19 {dimension_numbers = #tpu.dot_dimension_numbers<[1], [0], [0], [1], [0, 0, 1, 1], [], []>} : vector<32x32xf32>, vector<32x64xf32>, vector<32x64xf32> -> vector<32x64xf32>
    %c0_20 = arith.constant 0 : index
    %c0_21 = arith.constant 0 : index
    %20 = vector.load %arg8[%c0_20, %c0_21] : memref<2x64xf32, #tpu.memory_space<vmem>>, vector<2x64xf32>
    %cst_22 = arith.constant dense<0.000000e+00> : vector<32x64xf32>
    %21 = tpu.matmul %16, %20, %cst_22 {dimension_numbers = #tpu.dot_dimension_numbers<[1], [0], [0], [1], [0, 0, 1, 1], [], []>} : vector<32x2xf32>, vector<2x64xf32>, vector<32x64xf32> -> vector<32x64xf32>
    %22 = arith.addf %19, %21 : vector<32x64xf32>
    %c0_23 = arith.constant 0 : index
    %c0_24 = arith.constant 0 : index
    %23 = vector.load %arg9[%c0_23, %c0_24] : memref<1x64xf32, #tpu.memory_space<vmem>>, vector<1x64xf32>
    %24 = vector.broadcast %23 : vector<1x64xf32> to vector<32x64xf32>
    %25 = arith.addf %22, %24 : vector<32x64xf32>
    %cst_25 = arith.constant 0.000000e+00 : f32
    %26 = vector.broadcast %cst_25 : f32 to vector<32x64xf32>
    %27 = arith.maximumf %25, %26 : vector<32x64xf32>
    %cst_26 = arith.constant dense<0.000000e+00> : vector<2x64xf32>
    %28 = tpu.matmul %17, %27, %cst_26 {dimension_numbers = #tpu.dot_dimension_numbers<[1], [0], [0], [1], [0, 0, 1, 1], [], []>} : vector<2x32xf32>, vector<32x64xf32>, vector<2x64xf32> -> vector<2x64xf32>
    %c0_27 = arith.constant 0 : index
    %c0_28 = arith.constant 0 : index
    %29 = vector.load %arg10[%c0_27, %c0_28] : memref<64x128xf32, #tpu.memory_space<vmem>>, vector<64x128xf32>
    %cst_29 = arith.constant dense<0.000000e+00> : vector<2x128xf32>
    %30 = tpu.matmul %28, %29, %cst_29 {dimension_numbers = #tpu.dot_dimension_numbers<[1], [0], [0], [1], [0, 0, 1, 1], [], []>} : vector<2x64xf32>, vector<64x128xf32>, vector<2x128xf32> -> vector<2x128xf32>
    %c0_30 = arith.constant 0 : index
    %c0_31 = arith.constant 0 : index
    %31 = vector.load %arg11[%c0_30, %c0_31] : memref<1x128xf32, #tpu.memory_space<vmem>>, vector<1x128xf32>
    %32 = vector.broadcast %31 : vector<1x128xf32> to vector<2x128xf32>
    %33 = arith.addf %30, %32 : vector<2x128xf32>
    %c0_32 = arith.constant 0 : index
    %c0_33 = arith.constant 0 : index
    %34 = vector.load %arg17[%c0_32, %c0_33] : memref<2x128xf32, #tpu.memory_space<vmem>>, vector<2x128xf32>
    tpu.vector_store %arg17[%c0_32, %c0_33], %33 {strides = array<i32>} : memref<2x128xf32, #tpu.memory_space<vmem>>, vector<2x128xf32>,
    %c0_34 = arith.constant 0 : index
    %c0_35 = arith.constant 0 : index
    %35 = vector.load %arg12[%c0_34, %c0_35] : memref<32x64xf32, #tpu.memory_space<vmem>>, vector<32x64xf32>
    %cst_36 = arith.constant dense<0.000000e+00> : vector<32x64xf32>
    %36 = tpu.matmul %13, %35, %cst_36 {dimension_numbers = #tpu.dot_dimension_numbers<[1], [0], [0], [1], [0, 0, 1, 1], [], []>} : vector<32x32xf32>, vector<32x64xf32>, vector<32x64xf32> -> vector<32x64xf32>
    %c0_37 = arith.constant 0 : index
    %c0_38 = arith.constant 0 : index
    %37 = vector.load %arg13[%c0_37, %c0_38] : memref<2x64xf32, #tpu.memory_space<vmem>>, vector<2x64xf32>
    %cst_39 = arith.constant dense<0.000000e+00> : vector<32x64xf32>
    %38 = tpu.matmul %16, %37, %cst_39 {dimension_numbers = #tpu.dot_dimension_numbers<[1], [0], [0], [1], [0, 0, 1, 1], [], []>} : vector<32x2xf32>, vector<2x64xf32>, vector<32x64xf32> -> vector<32x64xf32>
    %39 = arith.addf %36, %38 : vector<32x64xf32>
    %c0_40 = arith.constant 0 : index
    %c0_41 = arith.constant 0 : index
    %40 = vector.load %arg14[%c0_40, %c0_41] : memref<1x64xf32, #tpu.memory_space<vmem>>, vector<1x64xf32>
    %41 = vector.broadcast %40 : vector<1x64xf32> to vector<32x64xf32>
    %42 = arith.addf %39, %41 : vector<32x64xf32>
    %cst_42 = arith.constant 0.000000e+00 : f32
    %43 = vector.broadcast %cst_42 : f32 to vector<32x64xf32>
    %44 = arith.maximumf %42, %43 : vector<32x64xf32>
    %cst_43 = arith.constant dense<0.000000e+00> : vector<2x64xf32>
    %45 = tpu.matmul %17, %44, %cst_43 {dimension_numbers = #tpu.dot_dimension_numbers<[1], [0], [0], [1], [0, 0, 1, 1], [], []>} : vector<2x32xf32>, vector<32x64xf32>, vector<2x64xf32> -> vector<2x64xf32>
    %c0_44 = arith.constant 0 : index
    %c0_45 = arith.constant 0 : index
    %46 = vector.load %arg15[%c0_44, %c0_45] : memref<64x128xf32, #tpu.memory_space<vmem>>, vector<64x128xf32>
    %cst_46 = arith.constant dense<0.000000e+00> : vector<2x128xf32>
    %47 = tpu.matmul %45, %46, %cst_46 {dimension_numbers = #tpu.dot_dimension_numbers<[1], [0], [0], [1], [0, 0, 1, 1], [], []>} : vector<2x64xf32>, vector<64x128xf32>, vector<2x128xf32> -> vector<2x128xf32>
    %c0_47 = arith.constant 0 : index
    %c0_48 = arith.constant 0 : index
    %48 = vector.load %arg16[%c0_47, %c0_48] : memref<1x128xf32, #tpu.memory_space<vmem>>, vector<1x128xf32>
    %49 = vector.broadcast %48 : vector<1x128xf32> to vector<2x128xf32>
    %50 = arith.addf %47, %49 : vector<2x128xf32>
    %c0_49 = arith.constant 0 : index
    %c0_50 = arith.constant 0 : index
    %51 = vector.load %arg18[%c0_49, %c0_50] : memref<2x128xf32, #tpu.memory_space<vmem>>, vector<2x128xf32>
    tpu.vector_store %arg18[%c0_49, %c0_50], %50 {strides = array<i32>} : memref<2x128xf32, #tpu.memory_space<vmem>>, vector<2x128xf32>,
    return
  }
}

module attributes {stable_mosaic.version = 11 : i64} {
  func.func @_feld_decoder_kernel(%arg0: memref<2x4x32xf32, #tpu.memory_space<vmem>>, %arg1: memref<2x4x32xf32, #tpu.memory_space<vmem>>, %arg2: memref<32x32xf32, #tpu.memory_space<vmem>>, %arg3: memref<1x32xf32, #tpu.memory_space<vmem>>, %arg4: memref<32x32xf32, #tpu.memory_space<vmem>>, %arg5: memref<1x32xf32, #tpu.memory_space<vmem>>, %arg6: memref<1x32xf32, #tpu.memory_space<vmem>>, %arg7: memref<1x32xf32, #tpu.memory_space<vmem>>, %arg8: memref<2x8x32xf32, #tpu.memory_space<vmem>>, %arg9: memref<2x8x2xf32, #tpu.memory_space<vmem>>, %arg10: memref<2x8x2xf32, #tpu.memory_space<vmem>>, %arg11: memref<1x1xf32, #tpu.memory_space<vmem>>, %arg12: memref<1x1xf32, #tpu.memory_space<vmem>>) attributes {dimension_semantics = [], scalar_prefetch = 0 : i64, scratch_operands = 0 : i64, tpu.core_type = #tpu.core_type<tc>} {
    %cst = arith.constant 0.000000e+00 : f32
    %0 = vector.broadcast %cst : f32 to vector<1x1xf32>
    %cst_0 = arith.constant 0.000000e+00 : f32
    %1 = vector.broadcast %cst_0 : f32 to vector<1x1xf32>
    %c0 = arith.constant 0 : index
    %c0_1 = arith.constant 0 : index
    %c0_2 = arith.constant 0 : index
    %2 = vector.load %arg1[%c0, %c0_1, %c0_2] : memref<2x4x32xf32, #tpu.memory_space<vmem>>, vector<1x4x32xf32>
    %3 = vector.shape_cast %2 : vector<1x4x32xf32> to vector<4x32xf32>
    %c0_3 = arith.constant 0 : index
    %c0_4 = arith.constant 0 : index
    %4 = vector.load %arg2[%c0_3, %c0_4] : memref<32x32xf32, #tpu.memory_space<vmem>>, vector<32x32xf32>
    %cst_5 = arith.constant dense<0.000000e+00> : vector<4x32xf32>
    %5 = tpu.matmul %3, %4, %cst_5 {dimension_numbers = #tpu.dot_dimension_numbers<[1], [0], [0], [1], [0, 0, 1, 1], [], []>} : vector<4x32xf32>, vector<32x32xf32>, vector<4x32xf32> -> vector<4x32xf32>
    %c0_6 = arith.constant 0 : index
    %c0_7 = arith.constant 0 : index
    %6 = vector.load %arg3[%c0_6, %c0_7] : memref<1x32xf32, #tpu.memory_space<vmem>>, vector<1x32xf32>
    %7 = vector.broadcast %6 : vector<1x32xf32> to vector<4x32xf32>
    %8 = arith.addf %5, %7 : vector<4x32xf32>
    %cst_8 = arith.constant 0.000000e+00 : f32
    %9 = vector.broadcast %cst_8 : f32 to vector<4x32xf32>
    %10 = arith.maximumf %8, %9 : vector<4x32xf32>
    %c0_9 = arith.constant 0 : index
    %c0_10 = arith.constant 0 : index
    %11 = vector.load %arg4[%c0_9, %c0_10] : memref<32x32xf32, #tpu.memory_space<vmem>>, vector<32x32xf32>
    %cst_11 = arith.constant dense<0.000000e+00> : vector<4x32xf32>
    %12 = tpu.matmul %10, %11, %cst_11 {dimension_numbers = #tpu.dot_dimension_numbers<[1], [0], [0], [1], [0, 0, 1, 1], [], []>} : vector<4x32xf32>, vector<32x32xf32>, vector<4x32xf32> -> vector<4x32xf32>
    %c0_12 = arith.constant 0 : index
    %c0_13 = arith.constant 0 : index
    %13 = vector.load %arg5[%c0_12, %c0_13] : memref<1x32xf32, #tpu.memory_space<vmem>>, vector<1x32xf32>
    %14 = vector.broadcast %13 : vector<1x32xf32> to vector<4x32xf32>
    %15 = arith.addf %12, %14 : vector<4x32xf32>
    %c0_14 = arith.constant 0 : index
    %c0_15 = arith.constant 0 : index
    %c0_16 = arith.constant 0 : index
    %16 = vector.load %arg0[%c0_14, %c0_15, %c0_16] : memref<2x4x32xf32, #tpu.memory_space<vmem>>, vector<1x4x32xf32>
    %17 = vector.shape_cast %16 : vector<1x4x32xf32> to vector<4x32xf32>
    %18 = arith.addf %17, %15 : vector<4x32xf32>
    %cst_17 = arith.constant dense<0.000000e+00> : vector<4xf32>
    %19 = vector.multi_reduction <add>, %18, %cst_17 [1] : vector<4x32xf32> to vector<4xf32>
    %20 = vector.shape_cast %19 : vector<4xf32> to vector<4x1xf32>
    %cst_18 = arith.constant 3.200000e+01 : f32
    %21 = vector.broadcast %cst_18 : f32 to vector<4x1xf32>
    %22 = arith.divf %20, %21 : vector<4x1xf32>
    %23 = vector.broadcast %22 : vector<4x1xf32> to vector<4x32xf32>
    %24 = arith.subf %18, %23 : vector<4x32xf32>
    %25 = arith.mulf %24, %24 : vector<4x32xf32>
    %cst_19 = arith.constant dense<0.000000e+00> : vector<4xf32>
    %26 = vector.multi_reduction <add>, %25, %cst_19 [1] : vector<4x32xf32> to vector<4xf32>
    %27 = vector.shape_cast %26 : vector<4xf32> to vector<4x1xf32>
    %cst_20 = arith.constant 3.200000e+01 : f32
    %28 = vector.broadcast %cst_20 : f32 to vector<4x1xf32>
    %29 = arith.divf %27, %28 : vector<4x1xf32>
    %30 = vector.broadcast %22 : vector<4x1xf32> to vector<4x32xf32>
    %31 = arith.subf %18, %30 : vector<4x32xf32>
    %cst_21 = arith.constant 9.99999974E-6 : f32
    %32 = vector.broadcast %cst_21 : f32 to vector<4x1xf32>
    %33 = arith.addf %29, %32 : vector<4x1xf32>
    %34 = math.rsqrt %33 : vector<4x1xf32>
    %35 = vector.broadcast %34 : vector<4x1xf32> to vector<4x32xf32>
    %36 = arith.mulf %31, %35 : vector<4x32xf32>
    %c0_22 = arith.constant 0 : index
    %c0_23 = arith.constant 0 : index
    %37 = vector.load %arg6[%c0_22, %c0_23] : memref<1x32xf32, #tpu.memory_space<vmem>>, vector<1x32xf32>
    %38 = vector.broadcast %37 : vector<1x32xf32> to vector<4x32xf32>
    %39 = arith.mulf %36, %38 : vector<4x32xf32>
    %c0_24 = arith.constant 0 : index
    %c0_25 = arith.constant 0 : index
    %40 = vector.load %arg7[%c0_24, %c0_25] : memref<1x32xf32, #tpu.memory_space<vmem>>, vector<1x32xf32>
    %41 = vector.broadcast %40 : vector<1x32xf32> to vector<4x32xf32>
    %42 = arith.addf %39, %41 : vector<4x32xf32>
    %c0_26 = arith.constant 0 : index
    %c0_27 = arith.constant 0 : index
    %c0_28 = arith.constant 0 : index
    %43 = vector.load %arg8[%c0_26, %c0_27, %c0_28] : memref<2x8x32xf32, #tpu.memory_space<vmem>>, vector<1x8x32xf32>
    %44 = vector.shape_cast %43 : vector<1x8x32xf32> to vector<8x32xf32>
    %cst_29 = arith.constant dense<0.000000e+00> : vector<8x4xf32>
    %45 = tpu.matmul %44, %42, %cst_29 {dimension_numbers = #tpu.dot_dimension_numbers<[1], [1], [0], [0], [0, 0, 1, 0], [], []>} : vector<8x32xf32>, vector<4x32xf32>, vector<8x4xf32> -> vector<8x4xf32>
    %46 = vector.extract_strided_slice %45 {offsets = [0, 0], sizes = [8, 2], strides = [1, 1]} : vector<8x4xf32> to vector<8x2xf32>
    %47 = vector.extract_strided_slice %45 {offsets = [0, 2], sizes = [8, 2], strides = [1, 1]} : vector<8x4xf32> to vector<8x2xf32>
    %cst_30 = arith.constant 0.000000e+00 : f32
    %48 = vector.broadcast %cst_30 : f32 to vector<8x2xf32>
    %49 = arith.maximumf %47, %48 : vector<8x2xf32>
    %50 = vector.broadcast %cst_30 : f32 to vector<8x2xf32>
    %51 = arith.subf %47, %50 : vector<8x2xf32>
    %52 = arith.cmpf one, %51, %51 : vector<8x2xf32>
    %53 = vector.broadcast %cst_30 : f32 to vector<8x2xf32>
    %54 = arith.addf %47, %53 : vector<8x2xf32>
    %55 = math.absf %51 : vector<8x2xf32>
    %cst_31 = arith.constant 0.000000e+00 : f32
    %56 = vector.broadcast %cst_31 : f32 to vector<8x2xf32>
    %57 = arith.subf %56, %55 : vector<8x2xf32>
    %58 = math.exp %57 : vector<8x2xf32>
    %59 = math.log1p %58 : vector<8x2xf32>
    %60 = arith.addf %49, %59 : vector<8x2xf32>
    %61 = arith.select %52, %54, %60 : vector<8x2xi1>, vector<8x2xf32>
    %cst_32 = arith.constant 0.899999976 : f32
    %62 = vector.broadcast %cst_32 : f32 to vector<8x2xf32>
    %63 = arith.mulf %62, %61 : vector<8x2xf32>
    %cst_33 = arith.constant 1.000000e-01 : f32
    %64 = vector.broadcast %cst_33 : f32 to vector<8x2xf32>
    %65 = arith.addf %64, %63 : vector<8x2xf32>
    %c0_34 = arith.constant 0 : index
    %c0_35 = arith.constant 0 : index
    %c0_36 = arith.constant 0 : index
    %66 = vector.load %arg9[%c0_34, %c0_35, %c0_36] : memref<2x8x2xf32, #tpu.memory_space<vmem>>, vector<1x8x2xf32>
    %67 = vector.shape_cast %66 : vector<1x8x2xf32> to vector<8x2xf32>
    %68 = arith.subf %67, %46 : vector<8x2xf32>
    %69 = arith.divf %68, %65 : vector<8x2xf32>
    %70 = arith.mulf %69, %69 : vector<8x2xf32>
    %cst_37 = arith.constant -5.000000e-01 : f32
    %71 = vector.broadcast %cst_37 : f32 to vector<8x2xf32>
    %72 = arith.mulf %71, %70 : vector<8x2xf32>
    %73 = math.log %65 : vector<8x2xf32>
    %74 = arith.subf %72, %73 : vector<8x2xf32>
    %cst_38 = arith.constant 0.918938517 : f32
    %75 = vector.broadcast %cst_38 : f32 to vector<8x2xf32>
    %76 = arith.subf %74, %75 : vector<8x2xf32>
    %c0_39 = arith.constant 0 : index
    %c0_40 = arith.constant 0 : index
    %c0_41 = arith.constant 0 : index
    %77 = vector.load %arg10[%c0_39, %c0_40, %c0_41] : memref<2x8x2xf32, #tpu.memory_space<vmem>>, vector<1x8x2xf32>
    %78 = vector.shape_cast %77 : vector<1x8x2xf32> to vector<8x2xf32>
    %79 = vector.shape_cast %46 : vector<8x2xf32> to vector<1x8x2xf32>
    tpu.vector_store %arg10[%c0_39, %c0_40, %c0_41], %79 {strides = array<i32>} : memref<2x8x2xf32, #tpu.memory_space<vmem>>, vector<1x8x2xf32>,
    %80 = vector.shape_cast %76 : vector<8x2xf32> to vector<1x8x2xf32>
    %cst_42 = arith.constant dense<0.000000e+00> : vector<1xf32>
    %81 = vector.multi_reduction <add>, %80, %cst_42 [1, 2] : vector<1x8x2xf32> to vector<1xf32>
    %82 = vector.shape_cast %81 : vector<1xf32> to vector<1x1x1xf32>
    %83 = vector.extract %82[0, 0, 0] : f32 from vector<1x1x1xf32>
    %84 = vector.broadcast %83 : f32 to vector<1x1xf32>
    %85 = arith.addf %0, %84 : vector<1x1xf32>
    %86 = arith.mulf %68, %68 : vector<8x2xf32>
    %87 = vector.shape_cast %86 : vector<8x2xf32> to vector<1x8x2xf32>
    %cst_43 = arith.constant dense<0.000000e+00> : vector<1xf32>
    %88 = vector.multi_reduction <add>, %87, %cst_43 [1, 2] : vector<1x8x2xf32> to vector<1xf32>
    %89 = vector.shape_cast %88 : vector<1xf32> to vector<1x1x1xf32>
    %90 = vector.extract %89[0, 0, 0] : f32 from vector<1x1x1xf32>
    %91 = vector.broadcast %90 : f32 to vector<1x1xf32>
    %92 = arith.addf %1, %91 : vector<1x1xf32>
    %c1 = arith.constant 1 : index
    %c0_44 = arith.constant 0 : index
    %c0_45 = arith.constant 0 : index
    %93 = vector.load %arg1[%c1, %c0_44, %c0_45] : memref<2x4x32xf32, #tpu.memory_space<vmem>>, vector<1x4x32xf32>
    %94 = vector.shape_cast %93 : vector<1x4x32xf32> to vector<4x32xf32>
    %c0_46 = arith.constant 0 : index
    %c0_47 = arith.constant 0 : index
    %95 = vector.load %arg2[%c0_46, %c0_47] : memref<32x32xf32, #tpu.memory_space<vmem>>, vector<32x32xf32>
    %cst_48 = arith.constant dense<0.000000e+00> : vector<4x32xf32>
    %96 = tpu.matmul %94, %95, %cst_48 {dimension_numbers = #tpu.dot_dimension_numbers<[1], [0], [0], [1], [0, 0, 1, 1], [], []>} : vector<4x32xf32>, vector<32x32xf32>, vector<4x32xf32> -> vector<4x32xf32>
    %c0_49 = arith.constant 0 : index
    %c0_50 = arith.constant 0 : index
    %97 = vector.load %arg3[%c0_49, %c0_50] : memref<1x32xf32, #tpu.memory_space<vmem>>, vector<1x32xf32>
    %98 = vector.broadcast %97 : vector<1x32xf32> to vector<4x32xf32>
    %99 = arith.addf %96, %98 : vector<4x32xf32>
    %cst_51 = arith.constant 0.000000e+00 : f32
    %100 = vector.broadcast %cst_51 : f32 to vector<4x32xf32>
    %101 = arith.maximumf %99, %100 : vector<4x32xf32>
    %c0_52 = arith.constant 0 : index
    %c0_53 = arith.constant 0 : index
    %102 = vector.load %arg4[%c0_52, %c0_53] : memref<32x32xf32, #tpu.memory_space<vmem>>, vector<32x32xf32>
    %cst_54 = arith.constant dense<0.000000e+00> : vector<4x32xf32>
    %103 = tpu.matmul %101, %102, %cst_54 {dimension_numbers = #tpu.dot_dimension_numbers<[1], [0], [0], [1], [0, 0, 1, 1], [], []>} : vector<4x32xf32>, vector<32x32xf32>, vector<4x32xf32> -> vector<4x32xf32>
    %c0_55 = arith.constant 0 : index
    %c0_56 = arith.constant 0 : index
    %104 = vector.load %arg5[%c0_55, %c0_56] : memref<1x32xf32, #tpu.memory_space<vmem>>, vector<1x32xf32>
    %105 = vector.broadcast %104 : vector<1x32xf32> to vector<4x32xf32>
    %106 = arith.addf %103, %105 : vector<4x32xf32>
    %c1_57 = arith.constant 1 : index
    %c0_58 = arith.constant 0 : index
    %c0_59 = arith.constant 0 : index
    %107 = vector.load %arg0[%c1_57, %c0_58, %c0_59] : memref<2x4x32xf32, #tpu.memory_space<vmem>>, vector<1x4x32xf32>
    %108 = vector.shape_cast %107 : vector<1x4x32xf32> to vector<4x32xf32>
    %109 = arith.addf %108, %106 : vector<4x32xf32>
    %cst_60 = arith.constant dense<0.000000e+00> : vector<4xf32>
    %110 = vector.multi_reduction <add>, %109, %cst_60 [1] : vector<4x32xf32> to vector<4xf32>
    %111 = vector.shape_cast %110 : vector<4xf32> to vector<4x1xf32>
    %cst_61 = arith.constant 3.200000e+01 : f32
    %112 = vector.broadcast %cst_61 : f32 to vector<4x1xf32>
    %113 = arith.divf %111, %112 : vector<4x1xf32>
    %114 = vector.broadcast %113 : vector<4x1xf32> to vector<4x32xf32>
    %115 = arith.subf %109, %114 : vector<4x32xf32>
    %116 = arith.mulf %115, %115 : vector<4x32xf32>
    %cst_62 = arith.constant dense<0.000000e+00> : vector<4xf32>
    %117 = vector.multi_reduction <add>, %116, %cst_62 [1] : vector<4x32xf32> to vector<4xf32>
    %118 = vector.shape_cast %117 : vector<4xf32> to vector<4x1xf32>
    %cst_63 = arith.constant 3.200000e+01 : f32
    %119 = vector.broadcast %cst_63 : f32 to vector<4x1xf32>
    %120 = arith.divf %118, %119 : vector<4x1xf32>
    %121 = vector.broadcast %113 : vector<4x1xf32> to vector<4x32xf32>
    %122 = arith.subf %109, %121 : vector<4x32xf32>
    %cst_64 = arith.constant 9.99999974E-6 : f32
    %123 = vector.broadcast %cst_64 : f32 to vector<4x1xf32>
    %124 = arith.addf %120, %123 : vector<4x1xf32>
    %125 = math.rsqrt %124 : vector<4x1xf32>
    %126 = vector.broadcast %125 : vector<4x1xf32> to vector<4x32xf32>
    %127 = arith.mulf %122, %126 : vector<4x32xf32>
    %c0_65 = arith.constant 0 : index
    %c0_66 = arith.constant 0 : index
    %128 = vector.load %arg6[%c0_65, %c0_66] : memref<1x32xf32, #tpu.memory_space<vmem>>, vector<1x32xf32>
    %129 = vector.broadcast %128 : vector<1x32xf32> to vector<4x32xf32>
    %130 = arith.mulf %127, %129 : vector<4x32xf32>
    %c0_67 = arith.constant 0 : index
    %c0_68 = arith.constant 0 : index
    %131 = vector.load %arg7[%c0_67, %c0_68] : memref<1x32xf32, #tpu.memory_space<vmem>>, vector<1x32xf32>
    %132 = vector.broadcast %131 : vector<1x32xf32> to vector<4x32xf32>
    %133 = arith.addf %130, %132 : vector<4x32xf32>
    %c1_69 = arith.constant 1 : index
    %c0_70 = arith.constant 0 : index
    %c0_71 = arith.constant 0 : index
    %134 = vector.load %arg8[%c1_69, %c0_70, %c0_71] : memref<2x8x32xf32, #tpu.memory_space<vmem>>, vector<1x8x32xf32>
    %135 = vector.shape_cast %134 : vector<1x8x32xf32> to vector<8x32xf32>
    %cst_72 = arith.constant dense<0.000000e+00> : vector<8x4xf32>
    %136 = tpu.matmul %135, %133, %cst_72 {dimension_numbers = #tpu.dot_dimension_numbers<[1], [1], [0], [0], [0, 0, 1, 0], [], []>} : vector<8x32xf32>, vector<4x32xf32>, vector<8x4xf32> -> vector<8x4xf32>
    %137 = vector.extract_strided_slice %136 {offsets = [0, 0], sizes = [8, 2], strides = [1, 1]} : vector<8x4xf32> to vector<8x2xf32>
    %138 = vector.extract_strided_slice %136 {offsets = [0, 2], sizes = [8, 2], strides = [1, 1]} : vector<8x4xf32> to vector<8x2xf32>
    %cst_73 = arith.constant 0.000000e+00 : f32
    %139 = vector.broadcast %cst_73 : f32 to vector<8x2xf32>
    %140 = arith.maximumf %138, %139 : vector<8x2xf32>
    %141 = vector.broadcast %cst_73 : f32 to vector<8x2xf32>
    %142 = arith.subf %138, %141 : vector<8x2xf32>
    %143 = arith.cmpf one, %142, %142 : vector<8x2xf32>
    %144 = vector.broadcast %cst_73 : f32 to vector<8x2xf32>
    %145 = arith.addf %138, %144 : vector<8x2xf32>
    %146 = math.absf %142 : vector<8x2xf32>
    %cst_74 = arith.constant 0.000000e+00 : f32
    %147 = vector.broadcast %cst_74 : f32 to vector<8x2xf32>
    %148 = arith.subf %147, %146 : vector<8x2xf32>
    %149 = math.exp %148 : vector<8x2xf32>
    %150 = math.log1p %149 : vector<8x2xf32>
    %151 = arith.addf %140, %150 : vector<8x2xf32>
    %152 = arith.select %143, %145, %151 : vector<8x2xi1>, vector<8x2xf32>
    %cst_75 = arith.constant 0.899999976 : f32
    %153 = vector.broadcast %cst_75 : f32 to vector<8x2xf32>
    %154 = arith.mulf %153, %152 : vector<8x2xf32>
    %cst_76 = arith.constant 1.000000e-01 : f32
    %155 = vector.broadcast %cst_76 : f32 to vector<8x2xf32>
    %156 = arith.addf %155, %154 : vector<8x2xf32>
    %c1_77 = arith.constant 1 : index
    %c0_78 = arith.constant 0 : index
    %c0_79 = arith.constant 0 : index
    %157 = vector.load %arg9[%c1_77, %c0_78, %c0_79] : memref<2x8x2xf32, #tpu.memory_space<vmem>>, vector<1x8x2xf32>
    %158 = vector.shape_cast %157 : vector<1x8x2xf32> to vector<8x2xf32>
    %159 = arith.subf %158, %137 : vector<8x2xf32>
    %160 = arith.divf %159, %156 : vector<8x2xf32>
    %161 = arith.mulf %160, %160 : vector<8x2xf32>
    %cst_80 = arith.constant -5.000000e-01 : f32
    %162 = vector.broadcast %cst_80 : f32 to vector<8x2xf32>
    %163 = arith.mulf %162, %161 : vector<8x2xf32>
    %164 = math.log %156 : vector<8x2xf32>
    %165 = arith.subf %163, %164 : vector<8x2xf32>
    %cst_81 = arith.constant 0.918938517 : f32
    %166 = vector.broadcast %cst_81 : f32 to vector<8x2xf32>
    %167 = arith.subf %165, %166 : vector<8x2xf32>
    %c1_82 = arith.constant 1 : index
    %c0_83 = arith.constant 0 : index
    %c0_84 = arith.constant 0 : index
    %168 = vector.load %arg10[%c1_82, %c0_83, %c0_84] : memref<2x8x2xf32, #tpu.memory_space<vmem>>, vector<1x8x2xf32>
    %169 = vector.shape_cast %168 : vector<1x8x2xf32> to vector<8x2xf32>
    %170 = vector.shape_cast %137 : vector<8x2xf32> to vector<1x8x2xf32>
    tpu.vector_store %arg10[%c1_82, %c0_83, %c0_84], %170 {strides = array<i32>} : memref<2x8x2xf32, #tpu.memory_space<vmem>>, vector<1x8x2xf32>,
    %171 = vector.shape_cast %167 : vector<8x2xf32> to vector<1x8x2xf32>
    %cst_85 = arith.constant dense<0.000000e+00> : vector<1xf32>
    %172 = vector.multi_reduction <add>, %171, %cst_85 [1, 2] : vector<1x8x2xf32> to vector<1xf32>
    %173 = vector.shape_cast %172 : vector<1xf32> to vector<1x1x1xf32>
    %174 = vector.extract %173[0, 0, 0] : f32 from vector<1x1x1xf32>
    %175 = vector.broadcast %174 : f32 to vector<1x1xf32>
    %176 = arith.addf %85, %175 : vector<1x1xf32>
    %177 = arith.mulf %159, %159 : vector<8x2xf32>
    %178 = vector.shape_cast %177 : vector<8x2xf32> to vector<1x8x2xf32>
    %cst_86 = arith.constant dense<0.000000e+00> : vector<1xf32>
    %179 = vector.multi_reduction <add>, %178, %cst_86 [1, 2] : vector<1x8x2xf32> to vector<1xf32>
    %180 = vector.shape_cast %179 : vector<1xf32> to vector<1x1x1xf32>
    %181 = vector.extract %180[0, 0, 0] : f32 from vector<1x1x1xf32>
    %182 = vector.broadcast %181 : f32 to vector<1x1xf32>
    %183 = arith.addf %92, %182 : vector<1x1xf32>
    %c0_87 = arith.constant 0 : index
    %c0_88 = arith.constant 0 : index
    %184 = vector.load %arg11[%c0_87, %c0_88] : memref<1x1xf32, #tpu.memory_space<vmem>>, vector<1x1xf32>
    tpu.vector_store %arg11[%c0_87, %c0_88], %176 {strides = array<i32>} : memref<1x1xf32, #tpu.memory_space<vmem>>, vector<1x1xf32>,
    %c0_89 = arith.constant 0 : index
    %c0_90 = arith.constant 0 : index
    %185 = vector.load %arg12[%c0_89, %c0_90] : memref<1x1xf32, #tpu.memory_space<vmem>>, vector<1x1xf32>
    tpu.vector_store %arg12[%c0_89, %c0_90], %183 {strides = array<i32>} : memref<1x1xf32, #tpu.memory_space<vmem>>, vector<1x1xf32>,
    return
  }
}

</mosaic_0001>

<bundles_post_ra>
// kernel: feld_forward.3
= control target key start
LH: loop header
LB: loop body
LE: loop exit
PB: predicated region body
PF: predicated region fallthrough
CT: control target
= control target key end

     0   :  { %18 = vsyncpa [#allocation3], 0  ;;  %v946_v1 = vmov 0.0   ;;  %vm947_vm0 = vmmov 0   ;;  %s1163_s0 = inlined_call_operand.vmem [shape: f32[2,4,32], index: 0, kind: input, shape index: {}]   ;;  %s1164_s1 = inlined_call_operand.vmem [shape: f32[2,4,32], index: 1, kind: input, shape index: {}]   ;;  %s1165_s2 = inlined_call_operand.vmem [shape: f32[32,32], index: 2, kind: input, shape index: {}]   ;;  %s1166_s3 = inlined_call_operand.vmem [shape: f32[1,32], index: 3, kind: input, shape index: {}]   ;;  %s1167_s4 = inlined_call_operand.vmem [shape: f32[32,32], index: 4, kind: input, shape index: {}]   ;;  %s1168_s5 = inlined_call_operand.vmem [shape: f32[1,32], index: 5, kind: input, shape index: {}]   ;;  %s1169_s6 = inlined_call_operand.vmem [shape: f32[1,32], index: 6, kind: input, shape index: {}]   ;;  %s1170_s7 = inlined_call_operand.vmem [shape: f32[1,32], index: 7, kind: input, shape index: {}]   ;;  %s1171_s8 = inlined_call_operand.vmem [shape: f32[2,8,32], index: 8, kind: input, shape index: {}]   ;;  %s1172_s9 = inlined_call_operand.vmem [shape: f32[2,8,2], index: 9, kind: input, shape index: {}]   ;;  %s1173_s10 = inlined_call_operand.vmem [shape: f32[2,8,2], index: 10, kind: output, shape index: {0}]   ;;  %s1174_s11 = inlined_call_operand.hbm [shape: f32[1,1], index: 11, kind: output, shape index: {1}]   ;;  %s1175_s12 = inlined_call_operand.hbm [shape: f32[1,1], index: 12, kind: output, shape index: {2}]  }
   0x1   :  { %v44_v0 = vld [vmem:[%s1165_s2 + $0x18] sm:$0xff]  ;;  %815 = vmatprep.subr.mxu0 %v946_v1  ;;  %v43_v2 = vld [vmem:[%s1165_s2 + $0x10] sm:$0xff]  ;;  %823 = vmatprep.mubr.msk.f32.mxu0 %vm947_vm0, %v946_v1 }
   0x2   :  { %v1028_v3 = vld [vmem:[%s1167_s4 + $0x18] sm:$0xff]  ;;  %816 = vmatpush3.msra.mxu0 %v44_v0  ;;  %826 = vmatprep.subr.mxu1 %v946_v1 }
   0x3   :  { %19 = vsyncpa [#allocation5], 0  ;;  %817 = vmatprep.subr.mxu0 %v946_v1  ;;  %v42_v4 = vld [vmem:[%s1165_s2 + $0x8] sm:$0xff]  ;;  %827 = vmatpush3.msra.mxu1 %v1028_v3  ;;  %v41_v5 = vld [vmem:[%s1165_s2] sm:$0xff]  ;;  %vm52_vm1 = vcmask 261120   ;;  %vm213_vm2 = vcmask 257024  }
   0x4   :  { %818 = vmatpush3.msra.mxu0 %v43_v2  ;;  %828 = vmatprep.subr.mxu1 %v946_v1  ;;  %v40_v6 = vld [vmem:[%s1164_s1] sm:$0xf]  ;;  %v129_v7 = vld [vmem:[%s1167_s4 + $0x10] sm:$0xff]  ;;  %v128_v8 = vld [vmem:[%s1167_s4 + $0x8] sm:$0xff]  ;;  %vm359_vm3 = vcmask 15360   ;;  %s949_s20 = smov [#allocation2]  }
   0x5   :  { %819 = vmatprep.subr.mxu0 %v946_v1  ;;  %834 = vmatprep.mubr.msk.f32.mxu1 %vm947_vm0, %v946_v1  ;;  %v127_v9 = vld [vmem:[%s1167_s4] sm:$0xff]  ;;  %s744_s21 = sshll.u32 %s949_s20, 4  ;;  %vm733_vm8 = vcmask 0   ;;  %s950_s4 = smov [#allocation4]   ;;  %s745_s21 = int_to_ptr.vmem [resolvable:$true] %s744_s21 }
   0x6   :  { %820 = vmatpush3.msra.mxu0 %v42_v4  ;;  %829 = vmatpush3.msra.mxu1 %v129_v7  ;;  %v768_v10 = vld [vmem:[%s1166_s3] ss:$0 sm:$0xff]  ;;  %v777_v15 = vld [vmem:[%s1164_s1 + $0x4] sm:$0xf]  ;;  %s754_s22 = sshll.u32 %s950_s4, 4  ;;  %s902_s24 = scalar_lea.vmem %s745_s21, 16  ;;  %s755_s22 = int_to_ptr.vmem [resolvable:$true] %s754_s22 }
   0x7   :  { %821 = vmatprep.subr.mxu0 %v946_v1  ;;  %830 = vmatprep.subr.mxu1 %v946_v1  ;;  %v770_v16 = vld [vmem:[%s1168_s5] ss:$0 sm:$0xff]  ;;  %v782_v48 = vld [vmem:[%s1163_s0 + $0x4] sm:$0xf]  ;;  %p903_p0 = scmp.ne.s32.totalorder %s745_s21, %s902_s24  ;;  %s906_s25 = scalar_lea.vmem %s745_s21, 32 }
   0x8   :  { %822 = vmatpush3.msra.mxu0 %v41_v5  ;;  %831 = vmatpush3.msra.mxu1 %v128_v8  ;;  %v211_v18 = vld [vmem:[%s1163_s0] sm:$0xf]  ;;  %s948_s0 = smov 126   ;;  %p907_p1 = scmp.lt.s32.totalorder %s745_s21, %s745_s21 }
   0x9   :  { %824 = vmatmul.mubr.msk.f32.vlgmr.msra.gmra.mxu0 %vm52_vm1, %v40_v6  ;;  %837 = vmatprep.subr.mxu0 %v946_v1  ;;  %v1090_v34 = vld [vmem:[%s1169_s6] ss:$0 sm:$0xff]  ;;  %p908_p2 = scmp.lt.s32.totalorder %s906_s25, %s902_s24 }
   0xa   :  { %839 = vmatprep.mubr.msk.f32.mxu0 %vm947_vm0, %v946_v1  ;;  %832 = vmatprep.subr.mxu1 %v946_v1  ;;  %v1095_v36 = vld [vmem:[%s1170_s7] ss:$0 sm:$0xff] }
   0xb   :  { %833 = vmatpush3.msra.mxu1 %v127_v9  ;;  %v244_v39 = vld [vmem:[%s1171_s8] sm:$0xff]  ;;  %p909_p3 = por %p908_p2, %p907_p1 }
   0xc   :  { %842 = vmatprep.subr.mxu1 %v946_v1 }
   0xd   :  { %p910_p4 = pnand %p909_p3, %p903_p0 }
  0xc9   :  { %v122_v11 = vpop.f32.mrf.mxu0 }
  0xca   :  { %v123_v12 = vadd.f32 %v768_v10, %v122_v11 }
  0xcb   :  { %v825_v13 = vpop.f32.mrf.mxu0 }
  0xcc   :  { %v126_v14 = vmax.f32 %v123_v12, 0.0 }
  0xce   :  { %835 = vmatmul.mubr.msk.f32.vlgmr.msra.gmra.mxu1 %vm52_vm1, %v126_v14 }
  0xcf   :  { %843 = vmatpush3.msra.mxu1 %v44_v0  ;;  %850 = vmatprep.mubr.msk.f32.mxu1 %vm947_vm0, %v946_v1 }
  0xd0   :  { %844 = vmatprep.subr.mxu1 %v946_v1 }
  0xd1   :  { %845 = vmatpush3.msra.mxu1 %v43_v2 }
  0xd2   :  { %846 = vmatprep.subr.mxu1 %v946_v1 }
  0xd3   :  { %847 = vmatpush3.msra.mxu1 %v42_v4 }
  0xd4   :  { %848 = vmatprep.subr.mxu1 %v946_v1 }
  0xd5   :  { %849 = vmatpush3.msra.mxu1 %v41_v5 }
  0xd6   :  { %864 = vmatprep.subr.mxu1 %v946_v1  ;;  %851 = vmatmul.mubr.msk.f32.vlgmr.msra.gmra.mxu1 %vm52_vm1, %v777_v15  ;;  %v785_v15 = vld [vmem:[%s1171_s8 + $0x8] sm:$0xff] }
  0xd7   :  { %866 = vmatprep.mubr.msk.f32.mxu1 %vm947_vm0, %v946_v1 }
 0x18e   :  { %v207_v17 = vpop.f32.mrf.mxu1 }
 0x18f   :  { %v208_v19 = vadd.f32 %v770_v16, %v207_v17 }
 0x190   :  { %v836_v20 = vpop.f32.mrf.mxu1 }
 0x191   :  { %v212_v21 = vadd.f32 %v211_v18, %v208_v19 }
 0x193   :  { %v214_v22 = vsel %vm213_vm2, %v212_v21, 0.0 }
 0x194   :  { %215 = vadd.xlane.f32.xlu0 %v214_v22 }
 0x196   :  { %v468_v28 = vpop.f32.mrf.mxu1 }
 0x197   :  { %v469_v40 = vadd.f32 %v768_v10, %v468_v28 }
 0x198   :  { %v852_v29 = vpop.f32.mrf.mxu1 }
 0x199   :  { %v472_v41 = vmax.f32 %v469_v40, 0.0 }
 0x21d   :  { %v216_v23 = vpop.xlane.xlu0 %215 }
 0x21e   :  { %v218_v24 = vmul.f32 0.03125, %v216_v23 }
 0x220   :  { %v219_v25 = vsub.f32 %v212_v21, %v218_v24 }
 0x222   :  { %v220_v26 = vmul.f32 %v219_v25, %v219_v25 }
 0x224   :  { %v221_v27 = vsel %vm213_vm2, %v220_v26, 0.0 }
 0x225   :  { %222 = vadd.xlane.f32.xlu0 %v221_v27 }
 0x2ae   :  { %v223_v30 = vpop.xlane.xlu0 %222 }
 0x2af   :  { %v224_v31 = vmul.f32 0.03125, %v223_v30 }
 0x2b1   :  { %v225_v32 = vadd.f32 1e-05, %v224_v31 }
 0x2b3   :  { %882 = vrsqrt.f32 %v225_v32 }
 0x2c0   :  { %v883_v33 = vpop.eup %882 }
 0x2c1   :  { %v227_v35 = vmul.f32 %v883_v33, %v219_v25 }
 0x2c3   :  { %v235_v37 = vmul.f32 %v1090_v34, %v227_v35 }
 0x2c5   :  { %v243_v38 = vadd.f32 %v1095_v36, %v235_v37 }
 0x2c7   :  { %838 = vmatpush3.xpose.msk.msra.mxu0 %vm52_vm1, %v243_v38 }
 0x2c8   :  { %853 = vmatprep.subr.mxu0 %v946_v1 }
 0x2ca   :  { %840 = vmatmul.mubr.msk.f32.vlgmr.msra.gmra.mxu0 %vm52_vm1, %v244_v39  ;;  %v341_v39 = vld [vmem:[%s1172_s9] sm:$0xff] }
 0x2cb   :  { %854 = vmatpush3.msra.mxu0 %v1028_v3  ;;  %861 = vmatprep.mubr.msk.f32.mxu0 %vm947_vm0, %v946_v1 }
 0x2cc   :  { %855 = vmatprep.subr.mxu0 %v946_v1 }
 0x2cd   :  { %856 = vmatpush3.msra.mxu0 %v129_v7 }
 0x2ce   :  { %857 = vmatprep.subr.mxu0 %v946_v1 }
 0x2cf   :  { %858 = vmatpush3.msra.mxu0 %v128_v8 }
 0x2d0   :  { %859 = vmatprep.subr.mxu0 %v946_v1 }
 0x2d1   :  { %860 = vmatpush3.msra.mxu0 %v127_v9 }
 0x2d2   :  { %862 = vmatmul.mubr.msk.f32.vlgmr.msra.gmra.mxu0 %vm52_vm1, %v472_v41 }
 0x38a   :  { %v1112_v42 = vpop.f32.mrf.mxu0 }
 0x38b   :  { %v324_v43 = vand.u32 2147483647, %v1112_v42  ;;  %360 = vst.msk [vmem:[%s1173_s10] sm:$0xff] %vm359_vm3, %v1112_v42  ;;  %v321_v61 = vmax.f32 %v1112_v42, 0.0  ;;  %vm322_vm5 = vcmp.ne.f32.partialorder %v1112_v42, %v1112_v42  ;;  %v342_v40 = vsub.f32 %v341_v39, %v1112_v42 }
 0x38c   :  { %v841_v44 = vpop.f32.mrf.mxu0 }
 0x38d   :  { %v325_v45 = vsub.f32 0.0, %v324_v43  ;;  %v373_v41 = vmul.f32 %v342_v40, %v342_v40 }
 0x38f   :  { %v326_v46 = vmul.f32 1.442695, %v325_v45  ;;  %v374_v43 = vsel %vm359_vm3, %v373_v41, 0.0 }
 0x391   :  { %884 = vpow2.f32 %v326_v46 }
 0x392   :  { %v553_v47 = vpop.f32.mrf.mxu0 }
 0x393   :  { %v554_v49 = vadd.f32 %v770_v16, %v553_v47 }
 0x394   :  { %v863_v50 = vpop.f32.mrf.mxu0 }
 0x395   :  { %v559_v51 = vadd.f32 %v782_v48, %v554_v49 }
 0x397   :  { %v560_v52 = vsel %vm213_vm2, %v559_v51, 0.0 }
 0x398   :  { %561 = vadd.xlane.f32.xlu1 %v560_v52 }
 0x39e   :  { %v885_v53 = vpop.eup %884 }
 0x39f   :  { %v328_v54 = vadd.f32 1.0, %v885_v53  ;;  %v331_v55 = vmul.f32 -0.5, %v885_v53  ;;  %v334_v57 = vand.u32 2147483647, %v885_v53 }
 0x3a1   :  { %886 = vlog2.f32 %v328_v54  ;;  %v332_v56 = vadd.f32 1.0, %v331_v55  ;;  %vm335_vm4 = vcmp.lt.f32.partialorder %v334_v57, 0.0004427343 }
 0x3a3   :  { %v333_v60 = vmul.f32 %v885_v53, %v332_v56 }
 0x3ae   :  { %v887_v58 = vpop.eup %886 }
 0x3af   :  { %v330_v59 = vmul.f32 0.6931472, %v887_v58 }
 0x3b1   :  { %v336_v62 = vsel %vm335_vm4, %v333_v60, %v330_v59 }
 0x3b2   :  { %v337_v63 = vadd.f32 %v336_v62, %v321_v61 }
 0x3b4   :  { %v338_v0 = vsel %vm322_vm5, %v1112_v42, %v337_v63  ;;  %v788_v42 = vld [vmem:[%s1172_s9 + $0x8] sm:$0xff] }
 0x3b5   :  { %v339_v1 = vmul.f32 0.9, %v338_v0 }
 0x3b7   :  { %v340_v2 = vadd.f32 0.1, %v339_v1 }
 0x3b9   :  { %344 = vrot.lane.b32.xlu0 %v340_v2, %s948_s0 }
 0x421   :  { %v562_v3 = vpop.xlane.xlu1 %561 }
 0x422   :  { %v563_v4 = vmul.f32 0.03125, %v562_v3 }
 0x424   :  { %v564_v5 = vsub.f32 %v559_v51, %v563_v4 }
 0x426   :  { %v565_v6 = vmul.f32 %v564_v5, %v564_v5 }
 0x428   :  { %v566_v7 = vsel %vm213_vm2, %v565_v6, 0.0 }
 0x429   :  { %567 = vadd.xlane.f32.xlu1 %v566_v7 }
 0x42b   :  { %v345_v44 = vpop.permute.xlu0 %344 }
 0x4b2   :  { %v568_v8 = vpop.xlane.xlu1 %567 }
 0x4b3   :  { %v569_v9 = vmul.f32 0.03125, %v568_v8 }
 0x4b5   :  { %v570_v10 = vadd.f32 1e-05, %v569_v9 }
 0x4b7   :  { %888 = vrsqrt.f32 %v570_v10 }
 0x4c4   :  { %v889_v11 = vpop.eup %888 }
 0x4c5   :  { %v572_v12 = vmul.f32 %v889_v11, %v564_v5 }
 0x4c7   :  { %v580_v13 = vmul.f32 %v1090_v34, %v572_v12 }
 0x4c9   :  { %v588_v14 = vadd.f32 %v1095_v36, %v580_v13 }
 0x4cb   :  { %865 = vmatpush3.xpose.msk.msra.mxu1 %vm52_vm1, %v588_v14 }
 0x4ce   :  { %867 = vmatmul.mubr.msk.f32.vlgmr.msra.gmra.mxu1 %vm52_vm1, %v785_v15 }
 0x58e   :  { %v663_v16 = vpop.f32.mrf.mxu1 }
 0x58f   :  { %v670_v17 = vand.u32 2147483647, %v663_v16  ;;  %790 = vst.msk [vmem:[%s1173_s10 + $0x8] sm:$0xff] %vm359_vm3, %v663_v16  ;;  %v667_v29 = vmax.f32 %v663_v16, 0.0  ;;  %vm668_vm7 = vcmp.ne.f32.partialorder %v663_v16, %v663_v16  ;;  %v689_v54 = vsub.f32 %v788_v42, %v663_v16 }
 0x590   :  { %v868_v18 = vpop.f32.mrf.mxu1 }
 0x591   :  { %v671_v19 = vsub.f32 0.0, %v670_v17  ;;  %v720_v63 = vmul.f32 %v689_v54, %v689_v54 }
 0x593   :  { %v672_v20 = vmul.f32 1.442695, %v671_v19  ;;  %v721_v0 = vsel %vm359_vm3, %v720_v63, 0.0 }
 0x595   :  { %890 = vpow2.f32 %v672_v20 }
 0x5a2   :  { %v891_v21 = vpop.eup %890 }
 0x5a3   :  { %v674_v22 = vadd.f32 1.0, %v891_v21  ;;  %v677_v23 = vmul.f32 -0.5, %v891_v21  ;;  %v680_v25 = vand.u32 2147483647, %v891_v21 }
 0x5a5   :  { %892 = vlog2.f32 %v674_v22  ;;  %v678_v24 = vadd.f32 1.0, %v677_v23  ;;  %vm681_vm6 = vcmp.lt.f32.partialorder %v680_v25, 0.0004427343 }
 0x5a6   :  { %894 = vlog2.f32 %v340_v2 }
 0x5a7   :  { %v679_v28 = vmul.f32 %v891_v21, %v678_v24 }
 0x5b2   :  { %v893_v26 = vpop.eup %892 }
 0x5b3   :  { %v676_v27 = vmul.f32 0.6931472, %v893_v26  ;;  %v895_v35 = vpop.eup %894 }
 0x5b4   :  { %v352_v36 = vmul.f32 0.6931472, %v895_v35 }
 0x5b5   :  { %v682_v30 = vsel %vm681_vm6, %v679_v28, %v676_v27 }
 0x5b6   :  { %v683_v31 = vadd.f32 %v682_v30, %v667_v29 }
 0x5b8   :  { %v684_v32 = vsel %vm668_vm7, %v663_v16, %v683_v31 }
 0x5b9   :  { %v685_v33 = vmul.f32 0.9, %v684_v32 }
 0x5bb   :  { %v686_v34 = vadd.f32 0.1, %v685_v33 }
 0x5bd   :  { %691 = vrot.lane.b32.xlu1 %v686_v34, %s948_s0  ;;  %896 = vlog2.f32 %v686_v34 }
 0x5be   :  { %898 = vrcp.f32 %v345_v44 }
 0x5c1   :  { %354 = vrot.lane.b32.xlu1 %v352_v36, %s948_s0 }
 0x5ca   :  { %v897_v37 = vpop.eup %896 }
 0x5cb   :  { %v699_v38 = vmul.f32 0.6931472, %v897_v37  ;;  %v899_v45 = vpop.eup %898 }
 0x5cc   :  { %v348_v46 = vmul.f32 %v899_v45, %v342_v40 }
 0x5cd   :  { %701 = vrot.lane.b32.xlu1 %v699_v38, %s948_s0 }
 0x5ce   :  { %v349_v47 = vmul.f32 %v348_v46, %v348_v46 }
 0x5d0   :  { %v350_v49 = vmul.f32 -0.5, %v349_v47 }
 0x5f1   :  { %375 = vadd.xlane.f32.xlu1 %v374_v43 }
 0x62f   :  { %v692_v48 = vpop.permute.xlu1 %691 }
 0x630   :  { %900 = vrcp.f32 %v692_v48 }
 0x633   :  { %v355_v50 = vpop.permute.xlu1 %354 }
 0x634   :  { %v357_v51 = vsub.f32 %v350_v49, %v355_v50 }
 0x636   :  { %v776_v52 = vadd.f32 -0.9189385, %v357_v51 }
 0x638   :  { %v361_v53 = vsel %vm359_vm3, %v776_v52, 0.0 }
 0x639   :  { %362 = vadd.xlane.f32.xlu0 %v361_v53 }
 0x63d   :  { %v901_v55 = vpop.eup %900 }
 0x63e   :  { %v695_v56 = vmul.f32 %v901_v55, %v689_v54 }
 0x63f   :  { %v702_v59 = vpop.permute.xlu1 %701 }
 0x640   :  { %v696_v57 = vmul.f32 %v695_v56, %v695_v56 }
 0x642   :  { %v697_v58 = vmul.f32 -0.5, %v696_v57 }
 0x644   :  { %v704_v60 = vsub.f32 %v697_v58, %v702_v59 }
 0x646   :  { %v789_v61 = vadd.f32 -0.9189385, %v704_v60 }
 0x648   :  { %v708_v62 = vsel %vm359_vm3, %v789_v61, 0.0 }
 0x649   :  { %709 = vadd.xlane.f32.xlu0 %v708_v62 }
 0x64d   :  { %722 = vadd.xlane.f32.xlu0 %v721_v0 }
 0x67a   :  { %v376_v1 = vpop.xlane.xlu1 %375 }
 0x67b   :  { %v377_v2 = vrot.slane %v376_v1, 4 }
 0x67d   :  { %v378_v3 = vadd.f32 %v377_v2, %v376_v1 }
 0x67f   :  { %v379_v4 = vrot.slane %v378_v3, 2 }
 0x681   :  { %v380_v8 = vadd.f32 %v379_v4, %v378_v3 }
 0x683   :  { %v381_v11 = vrot.slane %v380_v8, 1 }
 0x685   :  { %v382_v14 = vadd.f32 %v381_v11, %v380_v8 }
 0x6c2   :  { %v363_v5 = vpop.xlane.xlu0 %362 }
 0x6c3   :  { %v364_v6 = vrot.slane %v363_v5, 4 }
 0x6c5   :  { %v365_v7 = vadd.f32 %v364_v6, %v363_v5 }
 0x6c7   :  { %v366_v9 = vrot.slane %v365_v7, 2 }
 0x6c9   :  { %v367_v10 = vadd.f32 %v366_v9, %v365_v7 }
 0x6cb   :  { %v368_v12 = vrot.slane %v367_v10, 1 }
 0x6cd   :  { %v369_v13 = vadd.f32 %v368_v12, %v367_v10 }
 0x6cf   :  { %869 = vpush %v369_v13 }
 0x6d0   :  { %871 = vpush %v382_v14 }
 0x6d2   :  { %v710_v15 = vpop.xlane.xlu0 %709 }
 0x6d3   :  { %v711_v16 = vrot.slane %v710_v15, 4 }
 0x6d5   :  { %v712_v17 = vadd.f32 %v711_v16, %v710_v15 }
 0x6d6   :  { %v723_v18 = vpop.xlane.xlu0 %722 }
 0x6d7   :  { %v713_v19 = vrot.slane %v712_v17, 2  ;;  %v724_v20 = vrot.slane %v723_v18, 4 }
 0x6d9   :  { %v725_v21 = vadd.f32 %v724_v20, %v723_v18  ;;  %v714_v22 = vadd.f32 %v713_v19, %v712_v17 }
 0x6db   :  { %v726_v23 = vrot.slane %v725_v21, 2  ;;  %v715_v24 = vrot.slane %v714_v22, 1 }
 0x6dd   :  { %v727_v25 = vadd.f32 %v726_v23, %v725_v21  ;;  %v716_v26 = vadd.f32 %v715_v24, %v714_v22 }
 0x6df   :  { %873 = vpush %v716_v26  ;;  %v728_v27 = vrot.slane %v727_v25, 1 }
 0x6e1   :  { %v729_v28 = vadd.f32 %v728_v27, %v727_v25 }
 0x6e3   :  { %875 = vpush %v729_v28 }
 0x700   :  { %s870_s9 = spop %869 }
 0x701   :  { %s872_s19 = spop %871  ;;  %v371_v29 = vstv %s870_s9 }
 0x702   :  { %v384_v32 = vstv %s872_s19 }
 0x710   :  { %s874_s3 = spop %873 }
 0x711   :  { %v718_v30 = vstv %s874_s3 }
 0x712   :  { %v719_v31 = vadd.f32 %v718_v30, %v371_v29 }
 0x714   :  { %s876_s23 = spop %875  ;;  %734 = vst.msk [vmem:[#allocation2] sm:$0x1] %vm733_vm8, %v719_v31 }
 0x715   :  { %v731_v33 = vstv %s876_s23 }
 0x716   :  { %913 = shalt.err (!%p910_p4)
}
 0x717   :  { %747 = dma.vmem_to_hbm [thread:$0]  %s745_s21, 16, %s1174_s11, [#allocation3]   ;;  %v732_v34 = vadd.f32 %v731_v33, %v384_v32 }
 0x718   :  { %s922_s26 = scalar_lea.vmem %s755_s22, 16  ;;  %s926_s27 = scalar_lea.vmem %s755_s22, 32 }
 0x719   :  { %735 = vst.msk [vmem:[#allocation4] sm:$0x1] %vm733_vm8, %v732_v34  ;;  %p923_p5 = scmp.ne.s32.totalorder %s755_s22, %s922_s26  ;;  %p927_p6 = scmp.lt.s32.totalorder %s755_s22, %s755_s22 }
 0x71a   :  { %p928_p7 = scmp.lt.s32.totalorder %s926_s27, %s922_s26 }
 0x71c   :  { %p929_p8 = por %p928_p7, %p927_p6 }
 0x71e   :  { %p930_p9 = pnand %p929_p8, %p923_p5 }
 0x720   :  { %933 = shalt.err (!%p930_p9)
}
 0x721   :  { %757 = dma.vmem_to_hbm [thread:$0]  %s755_s22, 16, %s1175_s12, [#allocation5]  }
 0x722   :  { %942 = dma.done.wait [#allocation3], 16  }
 0x723   :  { %943 = vsyncadd [#allocation3], 4294967280 }
 0x724   :  { %944 = dma.done.wait [#allocation5], 16  }
 0x725   :  { %945 = vsyncadd [#allocation5], 4294967280 }
 0x726   :  { %766 = vsyncpa [#allocation3], 1 }
 0x727   :  { %767 = vsyncpa [#allocation5], 1 }

// kernel: feld_forward.2
= control target key start
LH: loop header
LB: loop body
LE: loop exit
PB: predicated region body
PF: predicated region fallthrough
CT: control target
= control target key end

     0   :  { %vm92_vm0 = vcmask 1042432   ;;  %vm73_vm1 = vcmask 23552   ;;  %vm208_vm2 = vcmask 261120   ;;  %vm347_vm3 = vcmask 1041408   ;;  %s1693_s3 = inlined_call_operand.vmem [shape: f32[3,32], index: 3, kind: input, shape index: {}]   ;;  %s1694_s0 = inlined_call_operand.vmem [shape: f32[48,3], index: 0, kind: input, shape index: {}]   ;;  %s1695_s5 = inlined_call_operand.vmem [shape: f32[32,32], index: 5, kind: input, shape index: {}]   ;;  %s1696_s7 = inlined_call_operand.vmem [shape: f32[32,64], index: 7, kind: input, shape index: {}]   ;;  %s1697_s4 = inlined_call_operand.vmem [shape: f32[1,32], index: 4, kind: input, shape index: {}]   ;;  %s1698_s8 = inlined_call_operand.vmem [shape: f32[2,64], index: 8, kind: input, shape index: {}]   ;;  %s1699_s1 = inlined_call_operand.vmem [shape: f32[32,2], index: 1, kind: input, shape index: {}]   ;;  %s1700_s6 = inlined_call_operand.vmem [shape: f32[1,32], index: 6, kind: input, shape index: {}]   ;;  %s1701_s19 = inlined_call_operand.vmem [shape: f32[16,32], index: 19, kind: output, shape index: {2}]   ;;  %s1702_s10 = inlined_call_operand.vmem [shape: f32[64,128], index: 10, kind: input, shape index: {}]   ;;  %s1703_s9 = inlined_call_operand.vmem [shape: f32[1,64], index: 9, kind: input, shape index: {}]   ;;  %s1704_s2 = inlined_call_operand.vmem [shape: f32[2,32], index: 2, kind: input, shape index: {}]   ;;  %s1705_s13 = inlined_call_operand.vmem [shape: f32[2,64], index: 13, kind: input, shape index: {}]   ;;  %s1706_s12 = inlined_call_operand.vmem [shape: f32[32,64], index: 12, kind: input, shape index: {}]   ;;  %s1707_s14 = inlined_call_operand.vmem [shape: f32[1,64], index: 14, kind: input, shape index: {}]   ;;  %s1708_s15 = inlined_call_operand.vmem [shape: f32[64,128], index: 15, kind: input, shape index: {}]   ;;  %s1709_s11 = inlined_call_operand.vmem [shape: f32[1,128], index: 11, kind: input, shape index: {}]   ;;  %s1710_s17 = inlined_call_operand.vmem [shape: f32[2,128], index: 17, kind: output, shape index: {0}]   ;;  %s1711_s16 = inlined_call_operand.vmem [shape: f32[1,128], index: 16, kind: input, shape index: {}]   ;;  %s1712_s18 = inlined_call_operand.vmem [shape: f32[2,128], index: 18, kind: output, shape index: {1}]  }
   0x1   :  { %1716 = sst [smem:[#allocation2_spill]] %s1693_s3  ;;  %v1075_v12 = vld [vmem:[%s1697_s4] ss:$0 sm:$0xff]  ;;  %vm334_vm4 = vcmask 15360   ;;  %v1503_v35 = vld [vmem:[%s1699_s1 + $0x8] sm:$0xff]  ;;  %v1513_v37 = vld [vmem:[%s1699_s1 + $0x10] sm:$0xff] }
   0x2   :  { %1717 = sst [smem:[#allocation3_spill]] %s1694_s0  ;;  %v333_v32 = vld [vmem:[%s1698_s8] sm:$0x3]  ;;  %v1520_v38 = vld [vmem:[%s1699_s1 + $0x18] sm:$0xff]  ;;  %v1329_v52 = vmov 0.0   ;;  %vm1330_vm5 = vmmov 0  }
   0x3   :  { %1718 = sst [smem:[#allocation4_spill]] %s1695_s5  ;;  %v1495_v34 = vld [vmem:[%s1699_s1] sm:$0xff]  ;;  %v628_v53 = vld [vmem:[%s1702_s10 + $0x38] sm:$0xff]  ;;  %v627_v54 = vld [vmem:[%s1702_s10 + $0x30] sm:$0xff]  ;;  %vm636_vm6 = vcmask 523264  }
   0x4   :  { %1719 = sst [smem:[#allocation5_spill]] %s1696_s7  ;;  %v1083_v40 = vld [vmem:[%s1700_s6] ss:$0 sm:$0xff]  ;;  %v626_v55 = vld [vmem:[%s1702_s10 + $0x28] sm:$0xff]  ;;  %v624_v57 = vld [vmem:[%s1702_s10 + $0x18] sm:$0xff] }
   0x5   :  { %s1720_s20 = sld [smem:[#allocation2_spill]]  ;;  %v625_v56 = vld [vmem:[%s1702_s10 + $0x20] sm:$0xff]  ;;  %v623_v58 = vld [vmem:[%s1702_s10 + $0x10] sm:$0xff]  ;;  %v622_v59 = vld [vmem:[%s1702_s10 + $0x8] sm:$0xff] }
   0x6   :  { %s1721_s22 = sld [smem:[#allocation3_spill]] }
   0x7   :  { %s1722_s27 = sld [smem:[#allocation4_spill]] }
   0x8   :  { %s1723_s28 = sld [smem:[#allocation5_spill]] }
   0xb   :  { %v65_v0 = vld [vmem:[%s1720_s20] sm:$0x7] }
   0xc   :  { %v59_v1 = vld [vmem:[%s1721_s22] sm:$0xff]  ;;  %v60_v2 = vld [vmem:[%s1721_s22 + $0x8] sm:$0xff]  ;;  %1187 = vmatprep.subr.msk.mxu0 %vm92_vm0, %v65_v0  ;;  %v61_v3 = vld [vmem:[%s1721_s22 + $0x10] sm:$0xff] }
   0xd   :  { %1189 = vmatprep.mubr.msk.f32.mxu0 %vm73_vm1, %v59_v1  ;;  %1188 = vmatpush3.msk.msra.mxu0 %vm92_vm0, %v65_v0  ;;  %v200_v4 = vld [vmem:[%s1722_s27 + $0x18] sm:$0xff]  ;;  %v199_v5 = vld [vmem:[%s1722_s27 + $0x10] sm:$0xff]  ;;  %v63_v7 = vld [vmem:[%s1721_s22 + $0x20] sm:$0xff] }
   0xe   :  { %1190 = vmatmul.mubr.msk.f32.vlgmr.msra.gmra.mxu0 %vm73_vm1, %v60_v2  ;;  %1198 = vmatprep.subr.mxu0 %v200_v4  ;;  %v62_v6 = vld [vmem:[%s1721_s22 + $0x18] sm:$0xff]  ;;  %v64_v8 = vld [vmem:[%s1721_s22 + $0x28] sm:$0xff]  ;;  %v197_v10 = vld [vmem:[%s1722_s27] sm:$0xff] }
   0xf   :  { %1192 = vmatprep.mubr.msk.f32.mxu0 %vm73_vm1, %v61_v3  ;;  %1199 = vmatpush3.msra.mxu0 %v200_v4  ;;  %v198_v9 = vld [vmem:[%s1722_s27 + $0x8] sm:$0xff]  ;;  %v332_v11 = vld [vmem:[%s1723_s28 + $0x18] sm:$0xff]  ;;  %v331_v31 = vld [vmem:[%s1723_s28 + $0x10] sm:$0xff] }
  0x10   :  { %1200 = vmatprep.subr.mxu0 %v199_v5  ;;  %1319 = vmatprep.subr.mxu1 %v200_v4  ;;  %v330_v33 = vld [vmem:[%s1723_s28 + $0x8] sm:$0xff]  ;;  %v329_v36 = vld [vmem:[%s1723_s28] sm:$0xff] }
  0x11   :  { %1201 = vmatpush3.msra.mxu0 %v199_v5  ;;  %1323 = vmatpush3.msra.mxu1 %v200_v4  ;;  %v1099_v4 = vld [vmem:[%s1703_s9] ss:$0 sm:$0xff] }
  0x12   :  { %1193 = vmatmul.mubr.msk.f32.gmra.mxu0 %vm73_vm1, %v62_v6  ;;  %1320 = vmatprep.subr.mxu1 %v199_v5 }
  0x13   :  { %1195 = vmatprep.mubr.msk.f32.mxu0 %vm73_vm1, %v63_v7  ;;  %1324 = vmatpush3.msra.mxu1 %v199_v5 }
  0x14   :  { %1202 = vmatprep.subr.mxu0 %v198_v9  ;;  %1321 = vmatprep.subr.mxu1 %v198_v9 }
  0x15   :  { %1203 = vmatpush3.msra.mxu0 %v198_v9  ;;  %1325 = vmatpush3.msra.mxu1 %v198_v9 }
  0x16   :  { %1196 = vmatmul.mubr.msk.f32.gmra.mxu0 %vm73_vm1, %v64_v8  ;;  %1204 = vmatprep.subr.mxu0 %v197_v10 }
  0x17   :  { %1322 = vmatprep.subr.mxu1 %v197_v10  ;;  %1205 = vmatpush3.msra.mxu0 %v197_v10 }
  0x18   :  { %1326 = vmatpush3.msra.mxu1 %v197_v10  ;;  %1215 = vmatprep.subr.msk.mxu0 %vm347_vm3, %v333_v32 }
  0x19   :  { %1223 = vmatprep.subr.mxu1 %v332_v11 }
  0xce   :  { %v1191_v13 = vpop.f32.mrf.mxu0 }
  0xcf   :  { %v168_v14 = vadd.f32 %v1191_v13, %v1075_v12 }
  0xd0   :  { %v162_v15 = vpop.f32.mrf.mxu0 }
  0xd1   :  { %v163_v16 = vadd.f32 %v1075_v12, %v162_v15  ;;  %v192_v19 = vmax.f32 %v168_v14, 0.0 }
  0xd2   :  { %v1194_v17 = vpop.f32.mrf.mxu0 }
  0xd3   :  { %v191_v18 = vmax.f32 %v163_v16, 0.0  ;;  %v178_v20 = vadd.f32 %v1194_v17, %v1075_v12  ;;  %v1593_v17 = vld [vmem:[%s1704_s2] sm:$0x3] }
  0xd4   :  { %v172_v21 = vpop.f32.mrf.mxu0 }
  0xd5   :  { %v173_v22 = vadd.f32 %v1075_v12, %v172_v21  ;;  %1206 = vmatprep.mubr.msk.f32.mxu0 %vm208_vm2, %v191_v18  ;;  %v194_v26 = vmax.f32 %v178_v20, 0.0  ;;  %v715_v18 = vld [vmem:[%s1705_s13] sm:$0x3]  ;;  %v713_v20 = vld [vmem:[%s1706_s12 + $0x10] sm:$0xff]  ;;  %v712_v21 = vld [vmem:[%s1706_s12 + $0x8] sm:$0xff] }
  0xd6   :  { %1207 = vmatmul.mubr.msk.f32.vlgmr.msra.gmra.mxu0 %vm208_vm2, %v192_v19  ;;  %v1197_v23 = vpop.f32.mrf.mxu0  ;;  %v714_v19 = vld [vmem:[%s1706_s12 + $0x18] sm:$0xff] }
  0xd7   :  { %v193_v24 = vmax.f32 %v173_v22, 0.0  ;;  %v188_v25 = vadd.f32 %v1197_v23, %v1075_v12  ;;  %1216 = vmatpush3.msk.msra.mxu0 %vm347_vm3, %v333_v32  ;;  %1217 = vmatprep.mubr.msk.f32.mxu0 %vm334_vm4, %v1495_v34  ;;  %v711_v22 = vld [vmem:[%s1706_s12] sm:$0xff] }
  0xd8   :  { %v182_v27 = vpop.f32.mrf.mxu0  ;;  %1237 = vmatprep.subr.mxu0 %v1329_v52  ;;  %v621_v23 = vld [vmem:[%s1702_s10] sm:$0xff] }
  0xd9   :  { %1209 = vmatprep.mubr.msk.f32.mxu1 %vm208_vm2, %v193_v24  ;;  %v183_v28 = vadd.f32 %v1075_v12, %v182_v27  ;;  %v196_v29 = vmax.f32 %v188_v25, 0.0 }
  0xda   :  { %1210 = vmatmul.mubr.msk.f32.vlgmr.msra.gmra.mxu1 %vm208_vm2, %v194_v26  ;;  %1218 = vmatmul.mubr.msk.f32.vlgmr.msra.gmra.mxu0 %vm334_vm4, %v1503_v35 }
  0xdb   :  { %v195_v30 = vmax.f32 %v183_v28, 0.0  ;;  %1224 = vmatpush3.msra.mxu1 %v332_v11  ;;  %1220 = vmatprep.mubr.msk.f32.mxu0 %vm334_vm4, %v1513_v37 }
  0xdc   :  { %1225 = vmatprep.subr.mxu1 %v331_v31 }
  0xdd   :  { %1212 = vmatprep.mubr.msk.f32.mxu1 %vm208_vm2, %v195_v30  ;;  %1226 = vmatpush3.msra.mxu1 %v331_v31 }
  0xde   :  { %1213 = vmatmul.mubr.msk.f32.gmra.mxu1 %vm208_vm2, %v196_v29  ;;  %1227 = vmatprep.subr.mxu1 %v330_v33 }
  0xdf   :  { %1228 = vmatpush3.msra.mxu1 %v330_v33  ;;  %1221 = vmatmul.mubr.msk.f32.gmra.mxu0 %vm334_vm4, %v1520_v38 }
  0xe0   :  { %1229 = vmatprep.subr.mxu1 %v329_v36  ;;  %1245 = vmatprep.mubr.msk.f32.mxu0 %vm1330_vm5, %v1329_v52 }
  0xe1   :  { %1230 = vmatpush3.msra.mxu1 %v329_v36 }
  0xe2   :  { %1248 = vmatprep.subr.mxu1 %v1329_v52 }
 0x196   :  { %v1208_v39 = vpop.f32.mrf.mxu0 }
 0x197   :  { %v1529_v43 = vadd.f32 %v1208_v39, %v1083_v40 }
 0x198   :  { %v293_v41 = vpop.f32.mrf.mxu0 }
 0x199   :  { %v1527_v42 = vadd.f32 %v1083_v40, %v293_v41 }
 0x19a   :  { %v1211_v44 = vpop.f32.mrf.mxu1  ;;  %v1219_v60 = vpop.f32.mrf.mxu0 }
 0x19b   :  { %1231 = vmatprep.mubr.msk.f32.mxu1 %vm208_vm2, %v1527_v42  ;;  %v1537_v47 = vadd.f32 %v1211_v44, %v1083_v40 }
 0x19c   :  { %v303_v45 = vpop.f32.mrf.mxu1  ;;  %1232 = vmatmul.mubr.msk.f32.vlgmr.msra.gmra.mxu1 %vm208_vm2, %v1529_v43  ;;  %v417_v61 = vpop.f32.mrf.mxu0 }
 0x19d   :  { %v1535_v46 = vadd.f32 %v1083_v40, %v303_v45  ;;  %1249 = vmatpush3.msra.mxu1 %v628_v53  ;;  %v976_v53 = vld [vmem:[%s1708_s15 + $0x10] sm:$0xff] }
 0x19e   :  { %v1214_v48 = vpop.f32.mrf.mxu1  ;;  %1250 = vmatprep.subr.mxu1 %v1329_v52 }
 0x19f   :  { %1234 = vmatprep.mubr.msk.f32.mxu1 %vm208_vm2, %v1535_v46  ;;  %v319_v49 = vadd.f32 %v1214_v48, %v1083_v40  ;;  %1251 = vmatpush3.msra.mxu1 %v627_v54  ;;  %v1222_v63 = vpop.f32.mrf.mxu0  ;;  %v980_v48 = vld [vmem:[%s1708_s15 + $0x30] sm:$0xff]  ;;  %v975_v54 = vld [vmem:[%s1708_s15 + $0x8] sm:$0xff] }
 0x1a0   :  { %1235 = vmatmul.mubr.msk.f32.gmra.mxu1 %vm208_vm2, %v1537_v47  ;;  %v313_v50 = vpop.f32.mrf.mxu1  ;;  %1252 = vmatprep.subr.mxu1 %v1329_v52 }
 0x1a1   :  { %323 = vst.msk [vmem:[%s1701_s19 + $0x8] sm:$0xff] %vm208_vm2, %v319_v49  ;;  %v314_v51 = vadd.f32 %v1083_v40, %v313_v50  ;;  %1264 = vmatprep.mubr.msk.f32.mxu1 %vm1330_vm5, %v1329_v52  ;;  %1253 = vmatpush3.msra.mxu1 %v626_v55  ;;  %v427_v5 = vpop.f32.mrf.mxu0  ;;  %v979_v49 = vld [vmem:[%s1708_s15 + $0x28] sm:$0xff]  ;;  %v978_v50 = vld [vmem:[%s1708_s15 + $0x20] sm:$0xff] }
 0x1a2   :  { %1254 = vmatprep.subr.mxu1 %v1329_v52  ;;  %v974_v55 = vld [vmem:[%s1708_s15] sm:$0xff] }
 0x1a3   :  { %322 = vst.msk [vmem:[%s1701_s19] sm:$0xff] %vm208_vm2, %v314_v51  ;;  %1255 = vmatpush3.msra.mxu1 %v625_v56  ;;  %v977_v51 = vld [vmem:[%s1708_s15 + $0x18] sm:$0xff]  ;;  %v1101_v56 = vld [vmem:[%s1709_s11] ss:$0 sm:$0xff] }
 0x1a4   :  { %1256 = vmatprep.subr.mxu1 %v1329_v52 }
 0x1a5   :  { %1257 = vmatpush3.msra.mxu1 %v624_v57 }
 0x1a6   :  { %1258 = vmatprep.subr.mxu1 %v1329_v52 }
 0x1a7   :  { %1259 = vmatpush3.msra.mxu1 %v623_v58 }
 0x1a8   :  { %1260 = vmatprep.subr.mxu1 %v1329_v52 }
 0x1a9   :  { %1261 = vmatpush3.msra.mxu1 %v622_v59 }
 0x1aa   :  { %1262 = vmatprep.subr.mxu1 %v1329_v52 }
 0x1ab   :  { %1263 = vmatpush3.msra.mxu1 %v621_v23 }
 0x1ac   :  { %1300 = vmatprep.subr.mxu1 %v1329_v52 }
 0x25c   :  { %v1233_v62 = vpop.f32.mrf.mxu1 }
 0x25d   :  { %v520_v2 = vadd.f32 %v1233_v62, %v1219_v60 }
 0x25e   :  { %v514_v0 = vpop.f32.mrf.mxu1 }
 0x25f   :  { %v515_v7 = vadd.f32 %v514_v0, %v417_v61  ;;  %v541_v10 = vadd.f32 %v1099_v4, %v520_v2  ;;  %v1114_v61 = vld [vmem:[%s1711_s16] ss:$0 sm:$0xff] }
 0x260   :  { %v1236_v1 = vpop.f32.mrf.mxu1 }
 0x261   :  { %v530_v3 = vadd.f32 %v1236_v1, %v1222_v63  ;;  %v540_v13 = vadd.f32 %v1099_v4, %v515_v7  ;;  %v545_v15 = vmax.f32 %v541_v10, 0.0 }
 0x262   :  { %v524_v6 = vpop.f32.mrf.mxu1 }
 0x263   :  { %v543_v8 = vadd.f32 %v1099_v4, %v530_v3  ;;  %v525_v9 = vadd.f32 %v524_v6, %v427_v5  ;;  %v544_v16 = vmax.f32 %v540_v13, 0.0 }
 0x265   :  { %v547_v11 = vmax.f32 %v543_v8, 0.0  ;;  %v542_v12 = vadd.f32 %v1099_v4, %v525_v9 }
 0x267   :  { %v546_v14 = vmax.f32 %v542_v12, 0.0  ;;  %1238 = vmatpush3.msra.mxu0 %v547_v11 }
 0x268   :  { %1239 = vmatprep.subr.mxu0 %v1329_v52 }
 0x269   :  { %1240 = vmatpush3.msra.mxu0 %v546_v14 }
 0x26a   :  { %1241 = vmatprep.subr.mxu0 %v1329_v52 }
 0x26b   :  { %1242 = vmatpush3.msra.mxu0 %v545_v15 }
 0x26c   :  { %1243 = vmatprep.subr.mxu0 %v1329_v52 }
 0x26d   :  { %1244 = vmatpush3.msra.mxu0 %v544_v16 }
 0x26e   :  { %1246 = vmatmul.mubr.msk.f32.vlgmr.msra.gmra.mxu0 %vm208_vm2, %v1593_v17  ;;  %1267 = vmatprep.subr.msk.mxu0 %vm347_vm3, %v715_v18 }
 0x26f   :  { %1268 = vmatpush3.msk.msra.mxu0 %vm347_vm3, %v715_v18  ;;  %1269 = vmatprep.mubr.msk.f32.mxu0 %vm334_vm4, %v1495_v34 }
 0x270   :  { %1275 = vmatprep.subr.mxu0 %v714_v19 }
 0x272   :  { %1270 = vmatmul.mubr.msk.f32.vlgmr.msra.gmra.mxu0 %vm334_vm4, %v1503_v35  ;;  %v1112_v35 = vld [vmem:[%s1707_s14] ss:$0 sm:$0xff] }
 0x273   :  { %1276 = vmatpush3.msra.mxu0 %v714_v19  ;;  %1272 = vmatprep.mubr.msk.f32.mxu0 %vm334_vm4, %v1513_v37 }
 0x274   :  { %1277 = vmatprep.subr.mxu0 %v713_v20 }
 0x275   :  { %1278 = vmatpush3.msra.mxu0 %v713_v20 }
 0x276   :  { %1273 = vmatmul.mubr.msk.f32.gmra.mxu0 %vm334_vm4, %v1520_v38  ;;  %1279 = vmatprep.subr.mxu0 %v712_v21 }
 0x277   :  { %1280 = vmatpush3.msra.mxu0 %v712_v21  ;;  %1283 = vmatprep.mubr.msk.f32.mxu0 %vm208_vm2, %v1527_v42 }
 0x278   :  { %1281 = vmatprep.subr.mxu0 %v711_v22 }
 0x279   :  { %1282 = vmatpush3.msra.mxu0 %v711_v22 }
 0x27a   :  { %1284 = vmatmul.mubr.msk.f32.vlgmr.msra.gmra.mxu0 %vm208_vm2, %v1529_v43  ;;  %1289 = vmatprep.subr.mxu0 %v1329_v52 }
 0x27b   :  { %1286 = vmatprep.mubr.msk.f32.mxu0 %vm208_vm2, %v1535_v46 }
 0x27e   :  { %1287 = vmatmul.mubr.msk.f32.gmra.mxu0 %vm208_vm2, %v1537_v47  ;;  %v981_v47 = vld [vmem:[%s1708_s15 + $0x38] sm:$0xff] }
 0x27f   :  { %1297 = vmatprep.mubr.msk.f32.mxu0 %vm1330_vm5, %v1329_v52 }
 0x32e   :  { %v617_v24 = vpop.f32.mrf.mxu0 }
 0x32f   :  { %1265 = vmatmul.mubr.msk.f32.vlgmr.msra.gmra.mxu1 %vm636_vm6, %v617_v24 }
 0x330   :  { %v1247_v25 = vpop.f32.mrf.mxu0  ;;  %1316 = vmatprep.mubr.msk.f32.mxu1 %vm1330_vm5, %v1329_v52  ;;  %1301 = vmatpush3.msra.mxu1 %v981_v47 }
 0x331   :  { %1302 = vmatprep.subr.mxu1 %v1329_v52 }
 0x332   :  { %v1271_v26 = vpop.f32.mrf.mxu0  ;;  %1303 = vmatpush3.msra.mxu1 %v980_v48 }
 0x333   :  { %1304 = vmatprep.subr.mxu1 %v1329_v52 }
 0x334   :  { %v785_v27 = vpop.f32.mrf.mxu0  ;;  %1305 = vmatpush3.msra.mxu1 %v979_v49 }
 0x335   :  { %1306 = vmatprep.subr.mxu1 %v1329_v52 }
 0x336   :  { %v1274_v28 = vpop.f32.mrf.mxu0  ;;  %1307 = vmatpush3.msra.mxu1 %v978_v50 }
 0x337   :  { %1308 = vmatprep.subr.mxu1 %v1329_v52 }
 0x338   :  { %v795_v29 = vpop.f32.mrf.mxu0  ;;  %1309 = vmatpush3.msra.mxu1 %v977_v51 }
 0x339   :  { %1310 = vmatprep.subr.mxu1 %v1329_v52 }
 0x33a   :  { %v1285_v30 = vpop.f32.mrf.mxu0  ;;  %1311 = vmatpush3.msra.mxu1 %v976_v53 }
 0x33b   :  { %v876_v33 = vadd.f32 %v1285_v30, %v1271_v26  ;;  %1312 = vmatprep.subr.mxu1 %v1329_v52 }
 0x33c   :  { %v870_v31 = vpop.f32.mrf.mxu0  ;;  %1313 = vmatpush3.msra.mxu1 %v975_v54 }
 0x33d   :  { %v871_v37 = vadd.f32 %v870_v31, %v785_v27  ;;  %v897_v40 = vadd.f32 %v1112_v35, %v876_v33  ;;  %1314 = vmatprep.subr.mxu1 %v1329_v52 }
 0x33e   :  { %v1288_v32 = vpop.f32.mrf.mxu0  ;;  %1315 = vmatpush3.msra.mxu1 %v974_v55 }
 0x33f   :  { %v886_v34 = vadd.f32 %v1288_v32, %v1274_v28  ;;  %v896_v43 = vadd.f32 %v1112_v35, %v871_v37  ;;  %v901_v45 = vmax.f32 %v897_v40, 0.0 }
 0x340   :  { %v880_v36 = vpop.f32.mrf.mxu0 }
 0x341   :  { %v899_v38 = vadd.f32 %v1112_v35, %v886_v34  ;;  %v881_v39 = vadd.f32 %v880_v36, %v795_v29  ;;  %v900_v46 = vmax.f32 %v896_v43, 0.0 }
 0x343   :  { %v903_v41 = vmax.f32 %v899_v38, 0.0  ;;  %v898_v42 = vadd.f32 %v1112_v35, %v881_v39 }
 0x345   :  { %v902_v44 = vmax.f32 %v898_v42, 0.0  ;;  %1290 = vmatpush3.msra.mxu0 %v903_v41 }
 0x346   :  { %1291 = vmatprep.subr.mxu0 %v1329_v52 }
 0x347   :  { %1292 = vmatpush3.msra.mxu0 %v902_v44 }
 0x348   :  { %1293 = vmatprep.subr.mxu0 %v1329_v52 }
 0x349   :  { %1294 = vmatpush3.msra.mxu0 %v901_v45 }
 0x34a   :  { %1295 = vmatprep.subr.mxu0 %v1329_v52 }
 0x34b   :  { %1296 = vmatpush3.msra.mxu0 %v900_v46 }
 0x34c   :  { %1298 = vmatmul.mubr.msk.f32.vlgmr.msra.gmra.mxu0 %vm208_vm2, %v1593_v17 }
 0x3ef   :  { %v706_v57 = vpop.f32.mrf.mxu1 }
 0x3f0   :  { %v707_v58 = vadd.f32 %v1101_v56, %v706_v57 }
 0x3f1   :  { %v1266_v59 = vpop.f32.mrf.mxu1 }
 0x3f2   :  { %710 = vst [vmem:[%s1710_s17] sm:$0x3] %v707_v58 }
 0x40c   :  { %v970_v60 = vpop.f32.mrf.mxu0 }
 0x40d   :  { %1317 = vmatmul.mubr.msk.f32.vlgmr.msra.gmra.mxu1 %vm636_vm6, %v970_v60 }
 0x40e   :  { %v1299_v52 = vpop.f32.mrf.mxu0 }
 0x4cd   :  { %v1058_v62 = vpop.f32.mrf.mxu1 }
 0x4ce   :  { %v1059_v63 = vadd.f32 %v1114_v61, %v1058_v62 }
 0x4cf   :  { %v1318_v0 = vpop.f32.mrf.mxu1 }
 0x4d0   :  { %1062 = vst [vmem:[%s1712_s18] sm:$0x3] %v1059_v63 }

</bundles_post_ra>
